<compile_context>
chip_gen: v6e
topology: v6e:2x2x1
jax: 0.10.0
libtpu: 0.0.40
codegen_flags: <defaults>
</compile_context>

<pallas_src>
import functools

import jax
import jax.numpy as jnp
from jax.experimental import pallas as pl
from jax.experimental.pallas import tpu as pltpu

INPUT_SIZE = 100
OUTPUT_SIZE = 784
HIDDEN = (128, 256, 512)

IN_PAD = 128    # lane-dense K for the first matmul (100 -> 128, zero-padded)


def _round_up(x, m):
    return (x + m - 1) // m * m


def generator_kernel(x_ref,
                     w1_ref, b1_ref,
                     w2_ref, b2_ref,
                     w3_ref, b3_ref,
                     w4_ref, b4_ref,
                     o_ref):
    # Entire MLP runs in-kernel for one batch tile: bf16 inputs to the MXU,
    # f32 accumulation, bias-add / ReLU / tanh in f32, bf16 store.
    h = jnp.dot(x_ref[...].astype(jnp.bfloat16), w1_ref[...],
                preferred_element_type=jnp.float32) + b1_ref[...]
    h = jnp.maximum(h, 0.0).astype(jnp.bfloat16)

    h = jnp.dot(h, w2_ref[...], preferred_element_type=jnp.float32) + b2_ref[...]
    h = jnp.maximum(h, 0.0).astype(jnp.bfloat16)

    h = jnp.dot(h, w3_ref[...], preferred_element_type=jnp.float32) + b3_ref[...]
    h = jnp.maximum(h, 0.0).astype(jnp.bfloat16)

    h = jnp.dot(h, w4_ref[...], preferred_element_type=jnp.float32) + b4_ref[...]
    o_ref[...] = jnp.tanh(h).astype(o_ref.dtype)


def prepare_params(params):
    """One-time conversion of f32 (W, b) params to the kernel's layout.

    Do this OUTSIDE the per-call path (it re-reads ~2.3 MB f32 and writes
    ~1.2 MB bf16; wasteful if repeated every forward).
    """
    (w1, b1), (w2, b2), (w3, b3), (w4, b4) = params
    w1_p = jnp.pad(w1, ((0, IN_PAD - INPUT_SIZE), (0, 0))).astype(jnp.bfloat16)
    return (w1_p, b1,
            w2.astype(jnp.bfloat16), b2,
            w3.astype(jnp.bfloat16), b3,
            w4.astype(jnp.bfloat16), b4)


def _choose_tile(B, batch_tile, align):
    """Pick a batch tile (multiple of `align`) with >=2 balanced grid steps
    for mid-size batches so v7x's two TensorCores both get work."""
    batch_tile = max(align, _round_up(batch_tile, align))
    if B <= batch_tile:
        if B > align:
            # Split into two balanced tiles (no-op cost on 1-TC v5e/v6e).
            return _round_up(pl.cdiv(B, 2), align)
        return align
    return batch_tile


def generator_forward(x, prepared_params, *, batch_tile=512,
                      out_dtype=jnp.bfloat16, vmem_limit_bytes=None):
    """x: (B, INPUT_SIZE) f32.  prepared_params: output of prepare_params()."""
    B, d_in = x.shape
    assert d_in == INPUT_SIZE
    w1, b1, w2, b2, w3, b3, w4, b4 = prepared_params

    # bf16 output blocks need a (16,128) sublane tile; f32 needs (8,128).
    align = 16 if jnp.dtype(out_dtype) == jnp.dtype(jnp.bfloat16) else 8
    tile = _choose_tile(B, batch_tile, align)
    Bp = _round_up(B, tile)
    grid = (Bp // tile,)

    # Zero-pad x along K (100 -> 128; zeros contribute nothing to the dot) and
    # along batch up to the tile multiple.  This is the only per-call copy.
    x_p = jnp.pad(x, ((0, Bp - B), (0, IN_PAD - INPUT_SIZE)))

    def resident_spec(arr):
        # Constant index map + single buffer: fetched once, resident in VMEM
        # across the whole grid (no redundant second weight buffer).
        return pl.BlockSpec(arr.shape, lambda i: (0, 0),
                            pipeline_mode=pl.Buffered(1))

    dims = (IN_PAD,) + HIDDEN + (OUTPUT_SIZE,)
    flops = 2 * Bp * sum(a * b for a, b in zip(dims[:-1], dims[1:]))
    bytes_accessed = (
        x_p.size * x_p.dtype.itemsize
        + sum(a.size * a.dtype.itemsize
              for a in (w1, w2, w3, w4, b1, b2, b3, b4))
        + Bp * OUTPUT_SIZE * jnp.dtype(out_dtype).itemsize
    )
    cost = pl.CostEstimate(flops=flops,
                           transcendentals=Bp * OUTPUT_SIZE,
                           bytes_accessed=bytes_accessed)

    out = pl.pallas_call(
        generator_kernel,
        out_shape=jax.ShapeDtypeStruct((Bp, OUTPUT_SIZE), out_dtype),
        grid=grid,
        in_specs=[
            pl.BlockSpec((tile, IN_PAD), lambda i: (i, 0)),
            resident_spec(w1), resident_spec(b1),
            resident_spec(w2), resident_spec(b2),
            resident_spec(w3), resident_spec(b3),
            resident_spec(w4), resident_spec(b4),
        ],
        # Last dim 784 == full array dim -> legal block; no 896-wide padded
        # buffer and no wrapper-side full-output slice copy anymore.
        out_specs=pl.BlockSpec((tile, OUTPUT_SIZE), lambda i: (i, 0)),
        compiler_params=pltpu.CompilerParams(
            dimension_semantics=("parallel",),
            vmem_limit_bytes=vmem_limit_bytes),
        cost_estimate=cost,
    )(x_p, w1, b1, w2, b2, w3, b3, w4, b4)

    # Only the padded batch rows (if any) are dropped; no feature-dim slice.
    if Bp != B:
        out = out[:B]
    return out


def init_params(key):
    """Deterministic parameter init (Kaiming-uniform-ish, like nn.Linear default)."""
    dims = (INPUT_SIZE,) + HIDDEN + (OUTPUT_SIZE,)
    params = []
    for i in range(len(dims) - 1):
        fan_in, fan_out = dims[i], dims[i + 1]
        key, kw, kb = jax.random.split(key, 3)
        bound = 1.0 / (fan_in ** 0.5)
        w = jax.random.uniform(kw, (fan_in, fan_out), jnp.float32, -bound, bound)
        b = jax.random.uniform(kb, (1, fan_out), jnp.float32, -bound, bound)
        params.append((w, b))
    return params


def reference_forward(x, params):
    h = x
    for i, (w, b) in enumerate(params):
        h = h @ w + b
        if i < len(params) - 1:
            h = jnp.maximum(h, 0.0)
        else:
            h = jnp.tanh(h)
    return h


if __name__ == "__main__":
    key = jax.random.PRNGKey(0)
    kp, kx = jax.random.split(key)
    params = init_params(kp)
    prepared = prepare_params(params)   # one-time weight cast/pad (outside jit loop)

    # Small test: batch not a multiple of the tile to exercise padding, and a
    # small explicit batch_tile so the grid has 2 steps (pipeline / megacore path).
    batch = 20
    x = jax.random.normal(kx, (batch, INPUT_SIZE), dtype=jnp.float32)

    fwd = jax.jit(functools.partial(generator_forward, batch_tile=16))
    out = jax.block_until_ready(fwd(x, prepared))

    ref = reference_forward(x, params)
    assert out.shape == (batch, OUTPUT_SIZE)
    assert out.dtype == jnp.bfloat16
    # bf16 matmul inputs + bf16 output with f32 accumulation: loosened tolerance
    # vs the f32 reference (tanh output lies in [-1, 1], bf16 rounding ~4e-3).
    max_err = float(jnp.max(jnp.abs(out.astype(jnp.float32) - ref)))
    assert max_err < 3e-2, f"max abs err {max_err}"

    print("KERNEL_OK")
</pallas_src>

<mosaic_0001>
module attributes {stable_mosaic.version = 11 : i64} {
  func.func @generator_kernel(%arg0: i32, %arg1: memref<16x128xf32, #tpu.memory_space<vmem>>, %arg2: memref<128x128xbf16, #tpu.memory_space<vmem>>, %arg3: memref<1x128xf32, #tpu.memory_space<vmem>>, %arg4: memref<128x256xbf16, #tpu.memory_space<vmem>>, %arg5: memref<1x256xf32, #tpu.memory_space<vmem>>, %arg6: memref<256x512xbf16, #tpu.memory_space<vmem>>, %arg7: memref<1x512xf32, #tpu.memory_space<vmem>>, %arg8: memref<512x784xbf16, #tpu.memory_space<vmem>>, %arg9: memref<1x784xf32, #tpu.memory_space<vmem>>, %arg10: memref<16x784xbf16, #tpu.memory_space<vmem>>) attributes {dimension_semantics = [#tpu.dimension_semantics<parallel>], iteration_bounds = array<i64: 2>, scalar_prefetch = 0 : i64, scratch_operands = 0 : i64, tpu.core_type = #tpu.core_type<tc>, window_params = [{transform_indices = @transform_0, window_bounds = array<i64: 16, 128>}, {pipeline_mode = #tpu.pipeline_mode<synchronous>, transform_indices = @transform_1, window_bounds = array<i64: 128, 128>}, {pipeline_mode = #tpu.pipeline_mode<synchronous>, transform_indices = @transform_2, window_bounds = array<i64: 1, 128>}, {pipeline_mode = #tpu.pipeline_mode<synchronous>, transform_indices = @transform_3, window_bounds = array<i64: 128, 256>}, {pipeline_mode = #tpu.pipeline_mode<synchronous>, transform_indices = @transform_4, window_bounds = array<i64: 1, 256>}, {pipeline_mode = #tpu.pipeline_mode<synchronous>, transform_indices = @transform_5, window_bounds = array<i64: 256, 512>}, {pipeline_mode = #tpu.pipeline_mode<synchronous>, transform_indices = @transform_6, window_bounds = array<i64: 1, 512>}, {pipeline_mode = #tpu.pipeline_mode<synchronous>, transform_indices = @transform_7, window_bounds = array<i64: 512, 784>}, {pipeline_mode = #tpu.pipeline_mode<synchronous>, transform_indices = @transform_8, window_bounds = array<i64: 1, 784>}, {transform_indices = @transform_9, window_bounds = array<i64: 16, 784>}]} {
    %c0 = arith.constant 0 : index
    %c0_0 = arith.constant 0 : index
    %0 = vector.load %arg1[%c0, %c0_0] : memref<16x128xf32, #tpu.memory_space<vmem>>, vector<16x128xf32>
    %1 = arith.truncf %0 : vector<16x128xf32> to vector<16x128xbf16>
    %c0_1 = arith.constant 0 : index
    %c0_2 = arith.constant 0 : index
    %2 = vector.load %arg2[%c0_1, %c0_2] : memref<128x128xbf16, #tpu.memory_space<vmem>>, vector<128x128xbf16>
    %cst = arith.constant dense<0.000000e+00> : vector<16x128xf32>
    %3 = tpu.matmul %1, %2, %cst {dimension_numbers = #tpu.dot_dimension_numbers<[1], [0], [0], [1], [0, 0, 1, 1], [], []>} : vector<16x128xbf16>, vector<128x128xbf16>, vector<16x128xf32> -> vector<16x128xf32>
    %c0_3 = arith.constant 0 : index
    %c0_4 = arith.constant 0 : index
    %4 = vector.load %arg3[%c0_3, %c0_4] : memref<1x128xf32, #tpu.memory_space<vmem>>, vector<1x128xf32>
    %5 = vector.broadcast %4 : vector<1x128xf32> to vector<16x128xf32>
    %6 = arith.addf %3, %5 : vector<16x128xf32>
    %cst_5 = arith.constant 0.000000e+00 : f32
    %7 = vector.broadcast %cst_5 : f32 to vector<16x128xf32>
    %8 = arith.maximumf %6, %7 : vector<16x128xf32>
    %9 = arith.truncf %8 : vector<16x128xf32> to vector<16x128xbf16>
    %c0_6 = arith.constant 0 : index
    %c0_7 = arith.constant 0 : index
    %10 = vector.load %arg4[%c0_6, %c0_7] : memref<128x256xbf16, #tpu.memory_space<vmem>>, vector<128x256xbf16>
    %cst_8 = arith.constant dense<0.000000e+00> : vector<16x256xf32>
    %11 = tpu.matmul %9, %10, %cst_8 {dimension_numbers = #tpu.dot_dimension_numbers<[1], [0], [0], [1], [0, 0, 1, 1], [], []>} : vector<16x128xbf16>, vector<128x256xbf16>, vector<16x256xf32> -> vector<16x256xf32>
    %c0_9 = arith.constant 0 : index
    %c0_10 = arith.constant 0 : index
    %12 = vector.load %arg5[%c0_9, %c0_10] : memref<1x256xf32, #tpu.memory_space<vmem>>, vector<1x256xf32>
    %13 = vector.broadcast %12 : vector<1x256xf32> to vector<16x256xf32>
    %14 = arith.addf %11, %13 : vector<16x256xf32>
    %cst_11 = arith.constant 0.000000e+00 : f32
    %15 = vector.broadcast %cst_11 : f32 to vector<16x256xf32>
    %16 = arith.maximumf %14, %15 : vector<16x256xf32>
    %17 = arith.truncf %16 : vector<16x256xf32> to vector<16x256xbf16>
    %c0_12 = arith.constant 0 : index
    %c0_13 = arith.constant 0 : index
    %18 = vector.load %arg6[%c0_12, %c0_13] : memref<256x512xbf16, #tpu.memory_space<vmem>>, vector<256x512xbf16>
    %cst_14 = arith.constant dense<0.000000e+00> : vector<16x512xf32>
    %19 = tpu.matmul %17, %18, %cst_14 {dimension_numbers = #tpu.dot_dimension_numbers<[1], [0], [0], [1], [0, 0, 1, 1], [], []>} : vector<16x256xbf16>, vector<256x512xbf16>, vector<16x512xf32> -> vector<16x512xf32>
    %c0_15 = arith.constant 0 : index
    %c0_16 = arith.constant 0 : index
    %20 = vector.load %arg7[%c0_15, %c0_16] : memref<1x512xf32, #tpu.memory_space<vmem>>, vector<1x512xf32>
    %21 = vector.broadcast %20 : vector<1x512xf32> to vector<16x512xf32>
    %22 = arith.addf %19, %21 : vector<16x512xf32>
    %cst_17 = arith.constant 0.000000e+00 : f32
    %23 = vector.broadcast %cst_17 : f32 to vector<16x512xf32>
    %24 = arith.maximumf %22, %23 : vector<16x512xf32>
    %25 = arith.truncf %24 : vector<16x512xf32> to vector<16x512xbf16>
    %c0_18 = arith.constant 0 : index
    %c0_19 = arith.constant 0 : index
    %26 = vector.load %arg8[%c0_18, %c0_19] : memref<512x784xbf16, #tpu.memory_space<vmem>>, vector<512x784xbf16>
    %cst_20 = arith.constant dense<0.000000e+00> : vector<16x784xf32>
    %27 = tpu.matmul %25, %26, %cst_20 {dimension_numbers = #tpu.dot_dimension_numbers<[1], [0], [0], [1], [0, 0, 1, 1], [], []>} : vector<16x512xbf16>, vector<512x784xbf16>, vector<16x784xf32> -> vector<16x784xf32>
    %c0_21 = arith.constant 0 : index
    %c0_22 = arith.constant 0 : index
    %28 = vector.load %arg9[%c0_21, %c0_22] : memref<1x784xf32, #tpu.memory_space<vmem>>, vector<1x784xf32>
    %29 = vector.broadcast %28 : vector<1x784xf32> to vector<16x784xf32>
    %30 = arith.addf %27, %29 : vector<16x784xf32>
    %31 = math.tanh %30 : vector<16x784xf32>
    %32 = arith.truncf %31 : vector<16x784xf32> to vector<16x784xbf16>
    %c0_23 = arith.constant 0 : index
    %c0_24 = arith.constant 0 : index
    %33 = vector.load %arg10[%c0_23, %c0_24] : memref<16x784xbf16, #tpu.memory_space<vmem>>, vector<16x784xbf16>
    tpu.vector_store %arg10[%c0_23, %c0_24], %32 {strides = array<i32>} : memref<16x784xbf16, #tpu.memory_space<vmem>>, vector<16x784xbf16>,
    return
  }
  func.func @transform_0(%arg0: i32) -> (i32, i32) {
    %c0_i32 = arith.constant 0 : i32
    %c0_i32_0 = arith.constant 0 : i32
    return %arg0, %c0_i32 : i32, i32
  }
  func.func @transform_1(%arg0: i32) -> (i32, i32) {
    %c0_i32 = arith.constant 0 : i32
    %c0_i32_0 = arith.constant 0 : i32
    %c0_i32_1 = arith.constant 0 : i32
    return %c0_i32, %c0_i32_0 : i32, i32
  }
  func.func @transform_2(%arg0: i32) -> (i32, i32) {
    %c0_i32 = arith.constant 0 : i32
    %c0_i32_0 = arith.constant 0 : i32
    %c0_i32_1 = arith.constant 0 : i32
    return %c0_i32, %c0_i32_0 : i32, i32
  }
  func.func @transform_3(%arg0: i32) -> (i32, i32) {
    %c0_i32 = arith.constant 0 : i32
    %c0_i32_0 = arith.constant 0 : i32
    %c0_i32_1 = arith.constant 0 : i32
    return %c0_i32, %c0_i32_0 : i32, i32
  }
  func.func @transform_4(%arg0: i32) -> (i32, i32) {
    %c0_i32 = arith.constant 0 : i32
    %c0_i32_0 = arith.constant 0 : i32
    %c0_i32_1 = arith.constant 0 : i32
    return %c0_i32, %c0_i32_0 : i32, i32
  }
  func.func @transform_5(%arg0: i32) -> (i32, i32) {
    %c0_i32 = arith.constant 0 : i32
    %c0_i32_0 = arith.constant 0 : i32
    %c0_i32_1 = arith.constant 0 : i32
    return %c0_i32, %c0_i32_0 : i32, i32
  }
  func.func @transform_6(%arg0: i32) -> (i32, i32) {
    %c0_i32 = arith.constant 0 : i32
    %c0_i32_0 = arith.constant 0 : i32
    %c0_i32_1 = arith.constant 0 : i32
    return %c0_i32, %c0_i32_0 : i32, i32
  }
  func.func @transform_7(%arg0: i32) -> (i32, i32) {
    %c0_i32 = arith.constant 0 : i32
    %c0_i32_0 = arith.constant 0 : i32
    %c0_i32_1 = arith.constant 0 : i32
    return %c0_i32, %c0_i32_0 : i32, i32
  }
  func.func @transform_8(%arg0: i32) -> (i32, i32) {
    %c0_i32 = arith.constant 0 : i32
    %c0_i32_0 = arith.constant 0 : i32
    %c0_i32_1 = arith.constant 0 : i32
    return %c0_i32, %c0_i32_0 : i32, i32
  }
  func.func @transform_9(%arg0: i32) -> (i32, i32) {
    %c0_i32 = arith.constant 0 : i32
    %c0_i32_0 = arith.constant 0 : i32
    return %arg0, %c0_i32 : i32, i32
  }
}

</mosaic_0001>

<bundles_post_ra>
// kernel: generator_forward.1
= control target key start
LH: loop header
LB: loop body
LE: loop exit
PB: predicated region body
PF: predicated region fallthrough
CT: control target
= control target key end

     0   :  { %s3990_s30 = smov 0   ;;  %s5029_s0 = inlined_call_operand.vmem [shape: f32[32,128], index: 0, kind: input, shape index: {}]   ;;  %s5030_s1 = inlined_call_operand.vmem [shape: bf16[128,128], index: 1, kind: input, shape index: {}]   ;;  %s5031_s2 = inlined_call_operand.vmem [shape: f32[1,128], index: 2, kind: input, shape index: {}]   ;;  %s5032_s3 = inlined_call_operand.vmem [shape: bf16[128,256], index: 3, kind: input, shape index: {}]   ;;  %s5033_s4 = inlined_call_operand.vmem [shape: f32[1,256], index: 4, kind: input, shape index: {}]   ;;  %s5034_s5 = inlined_call_operand.vmem [shape: bf16[256,512], index: 5, kind: input, shape index: {}]   ;;  %s5035_s6 = inlined_call_operand.vmem [shape: f32[1,512], index: 6, kind: input, shape index: {}]   ;;  %s5036_s7 = inlined_call_operand.vmem [shape: bf16[512,784], index: 7, kind: input, shape index: {}]   ;;  %s5037_s8 = inlined_call_operand.vmem [shape: f32[1,784], index: 8, kind: input, shape index: {}]   ;;  %s5038_s9 = inlined_call_operand.vmem [shape: bf16[32,784], index: 9, kind: output, shape index: {}]  }
   0x1 LB: > { %s3028_s10 = sadd.s32 4294967295, %s3935_s30   ;;  %p3032_p0 = scmp.ge.s32.totalorder %s3935_s30, 1  ;;  %s3935_s30 = sphi %s3990_s30, %s19_s30  }
   0x2   : > { %p288_p1 = scmp.lt.s32.totalorder %s3935_s30, 3 }
   0x4   : > { %p289_p2 = pnand %p3032_p0, %p288_p1 }
   0x5   : > { %s3033_s17 = sshll.u32 (!%p289_p2), %s3028_s10, 1 }
   0x6   : > { %292 = sbr.rel (%p289_p2) target bundleno = 1041 (0x411), region = 56  ;;  %p326_p3 = scmp.lt.s32.totalorder (!%p289_p2), %s3033_s17, 3 }
   0xb   : > { %v3453_v0 = vld [vmem:[%s5030_s1 + $0x38] sm:$0xff]   ;;  %v3937_v1 = vmov 0.0   ;;  %v3454_v2 = vld [vmem:[%s5030_s1 + $0x30] sm:$0xff]   ;;  %vm3938_vm0 = vmmov 0   ;;  %v3455_v3 = vld [vmem:[%s5030_s1 + $0x28] sm:$0xff]   ;;  %s5040_s17 = smov (!%p326_p3, %s3033_s17), 3 }
   0xc   : > { %3421 = vmatprep.subr.bf16.mxu0 %v3937_v1  ;;  %3437 = vmatprep.mubr.msk.bf16.mxu0 %vm3938_vm0, %v3937_v1  ;;  %v3461_v4 = vld [vmem:[%s5032_s3 + $0x74] ss:$8 sps:$4 sm:$0xff]   ;;  %v3456_v5 = vld [vmem:[%s5030_s1 + $0x20] sm:$0xff]   ;;  %v3463_v6 = vld [vmem:[%s5032_s3 + $0x70] ss:$8 sps:$4 sm:$0xff]   ;;  %s3034_s21 = sshll.u32 %s5040_s17, 3 }
   0xd   : > { %3422 = vmatpush3.bf16.msra.mxu0 %v3453_v0  ;;  %565 = vmatprep.subr.bf16.mxu1 %v3461_v4  ;;  %v3464_v7 = vld [vmem:[%s5032_s3 + $0x64] ss:$8 sps:$4 sm:$0xff]   ;;  %v3466_v8 = vld [vmem:[%s5032_s3 + $0x60] ss:$8 sps:$4 sm:$0xff]   ;;  %v3467_v9 = vld [vmem:[%s5032_s3 + $0x54] ss:$8 sps:$4 sm:$0xff]   ;;  %s329_s28 = scalar_lea.vmem %s5029_s0, %s3034_s21 }
   0xe   : > { %3423 = vmatprep.subr.bf16.mxu0 %v3937_v1  ;;  %566 = vmatpush1.bf16.msra.mxu1 %v3463_v6  ;;  %v3457_v10 = vld [vmem:[%s5030_s1 + $0x18] sm:$0xff]   ;;  %v3458_v12 = vld [vmem:[%s5030_s1 + $0x10] sm:$0xff]   ;;  %v3470_v13 = vld [vmem:[%s5032_s3 + $0x44] ss:$8 sps:$4 sm:$0xff]   ;;  %v3939_v28 = vmov 0   ;;  %s3441_s21 = smul.u32 28, %s5040_s17 }
   0xf   : > { %567 = vmatprep.subr.bf16.mxu1 %v3464_v7  ;;  %v3469_v11 = vld [vmem:[%s5032_s3 + $0x50] ss:$8 sps:$4 sm:$0xff]   ;;  %v3472_v14 = vld [vmem:[%s5032_s3 + $0x40] ss:$8 sps:$4 sm:$0xff]   ;;  %v3473_v15 = vld [vmem:[%s5032_s3 + $0x34] ss:$8 sps:$4 sm:$0xff]   ;;  %597 = vmatprep.mubr.bf16.mxu1 %v3939_v28 }
  0x10   : > { %v3459_v16 = vld [vmem:[%s5030_s1 + $0x8] sm:$0xff]   ;;  %v3475_v17 = vld [vmem:[%s5032_s3 + $0x30] ss:$8 sps:$4 sm:$0xff]   ;;  %v3460_v19 = vld [vmem:[%s5030_s1] sm:$0xff]   ;;  %s5004_s24 = scalar_lea.vmem %s5038_s9, %s3441_s21  ;;  %vm2964_vm1 = vcmask 125952  }
  0x11   : > { %3424 = vmatpush3.bf16.msra.mxu0 %v3454_v2  ;;  %v3476_v18 = vld [vmem:[%s5032_s3 + $0x24] ss:$8 sps:$4 sm:$0xff]   ;;  %v3478_v23 = vld [vmem:[%s5032_s3 + $0x20] ss:$8 sps:$4 sm:$0xff]   ;;  %v3479_v24 = vld [vmem:[%s5032_s3 + $0x14] ss:$8 sps:$4 sm:$0xff]  }
  0x12   : > { %3425 = vmatprep.subr.bf16.mxu0 %v3937_v1  ;;  %568 = vmatpush1.bf16.msra.mxu1 %v3466_v8  ;;  %v339_v20 = vld [vmem:[%s329_s28] sm:$0xff]  ;;  %v340_v21 = vld [vmem:[%s329_s28 + $0x8] sm:$0xff]  ;;  %v3481_v25 = vld [vmem:[%s5032_s3 + $0x10] ss:$8 sps:$4 sm:$0xff]  }
  0x13   : > { %569 = vmatprep.subr.bf16.mxu1 %v3467_v9  ;;  %v341_v22 = vpack.c.bf16 %v340_v21, %v339_v20  ;;  %v3482_v26 = vld [vmem:[%s5032_s3 + $0x4] ss:$8 sps:$4 sm:$0xff]   ;;  %v3484_v27 = vld [vmem:[%s5032_s3] ss:$8 sps:$4 sm:$0xff]  }
  0x14   : > { %v3485_v29 = vld [vmem:[%s5034_s5 + $0xe0] ss:$16 sps:$4 sm:$0xff]   ;;  %v3487_v30 = vld [vmem:[%s5034_s5 + $0xe4] ss:$16 sps:$4 sm:$0xff]   ;;  %v3490_v31 = vld [vmem:[%s5034_s5 + $0xec] ss:$16 sps:$4 sm:$0xff]  }
  0x15   : > { %3426 = vmatpush3.bf16.msra.mxu0 %v3455_v3  ;;  %v3493_v32 = vld [vmem:[%s5034_s5 + $0xc4] ss:$16 sps:$4 sm:$0xff]   ;;  %v3491_v33 = vld [vmem:[%s5034_s5 + $0xc0] ss:$16 sps:$4 sm:$0xff]   ;;  %v3496_v3 = vld [vmem:[%s5034_s5 + $0xcc] ss:$16 sps:$4 sm:$0xff]  }
  0x16   : > { %3427 = vmatprep.subr.bf16.mxu0 %v3937_v1  ;;  %570 = vmatpush1.bf16.msra.mxu1 %v3469_v11  ;;  %v3499_v34 = vld [vmem:[%s5034_s5 + $0xa4] ss:$16 sps:$4 sm:$0xff]   ;;  %v3497_v35 = vld [vmem:[%s5034_s5 + $0xa0] ss:$16 sps:$4 sm:$0xff]   ;;  %v3494_v4 = vld [vmem:[%s5034_s5 + $0xc8] ss:$16 sps:$4 sm:$0xff]  }
  0x17   : > { %571 = vmatprep.subr.bf16.mxu1 %v3470_v13  ;;  %v3505_v36 = vld [vmem:[%s5034_s5 + $0x84] ss:$16 sps:$4 sm:$0xff]   ;;  %v3503_v37 = vld [vmem:[%s5034_s5 + $0x80] ss:$16 sps:$4 sm:$0xff]   ;;  %v3500_v6 = vld [vmem:[%s5034_s5 + $0xa8] ss:$16 sps:$4 sm:$0xff]  }
  0x18   : > { %v3511_v38 = vld [vmem:[%s5034_s5 + $0x64] ss:$16 sps:$4 sm:$0xff]   ;;  %v3509_v39 = vld [vmem:[%s5034_s5 + $0x60] ss:$16 sps:$4 sm:$0xff]   ;;  %v3508_v7 = vld [vmem:[%s5034_s5 + $0x8c] ss:$16 sps:$4 sm:$0xff]  }
  0x19   : > { %3428 = vmatpush3.bf16.msra.mxu0 %v3456_v5  ;;  %v3517_v40 = vld [vmem:[%s5034_s5 + $0x44] ss:$16 sps:$4 sm:$0xff]   ;;  %v3515_v41 = vld [vmem:[%s5034_s5 + $0x40] ss:$16 sps:$4 sm:$0xff]   ;;  %v3502_v5 = vld [vmem:[%s5034_s5 + $0xac] ss:$16 sps:$4 sm:$0xff]  }
  0x1a   : > { %3429 = vmatprep.subr.bf16.mxu0 %v3937_v1  ;;  %572 = vmatpush1.bf16.msra.mxu1 %v3472_v14  ;;  %v3523_v42 = vld [vmem:[%s5034_s5 + $0x24] ss:$16 sps:$4 sm:$0xff]   ;;  %v3521_v43 = vld [vmem:[%s5034_s5 + $0x20] ss:$16 sps:$4 sm:$0xff]   ;;  %v3506_v8 = vld [vmem:[%s5034_s5 + $0x88] ss:$16 sps:$4 sm:$0xff]  }
  0x1b   : > { %573 = vmatprep.subr.bf16.mxu1 %v3473_v15  ;;  %v3529_v44 = vld [vmem:[%s5034_s5 + $0x4] ss:$16 sps:$4 sm:$0xff]   ;;  %v3527_v45 = vld [vmem:[%s5034_s5] ss:$16 sps:$4 sm:$0xff]   ;;  %v3514_v9 = vld [vmem:[%s5034_s5 + $0x6c] ss:$16 sps:$4 sm:$0xff]  }
  0x1c   : > { %v3535_v46 = vld [vmem:[%s5034_s5 + $0x1e4] ss:$16 sps:$4 sm:$0xff]   ;;  %v3533_v47 = vld [vmem:[%s5034_s5 + $0x1e0] ss:$16 sps:$4 sm:$0xff]   ;;  %v3520_v11 = vld [vmem:[%s5034_s5 + $0x4c] ss:$16 sps:$4 sm:$0xff]  }
  0x1d   : > { %3430 = vmatpush3.bf16.msra.mxu0 %v3457_v10  ;;  %v3541_v48 = vld [vmem:[%s5034_s5 + $0x1c4] ss:$16 sps:$4 sm:$0xff]   ;;  %v3539_v49 = vld [vmem:[%s5034_s5 + $0x1c0] ss:$16 sps:$4 sm:$0xff]   ;;  %v3512_v10 = vld [vmem:[%s5034_s5 + $0x68] ss:$16 sps:$4 sm:$0xff]  }
  0x1e   : > { %3431 = vmatprep.subr.bf16.mxu0 %v3937_v1  ;;  %574 = vmatpush1.bf16.msra.mxu1 %v3475_v17  ;;  %v3547_v50 = vld [vmem:[%s5034_s5 + $0x1a4] ss:$16 sps:$4 sm:$0xff]   ;;  %v3545_v51 = vld [vmem:[%s5034_s5 + $0x1a0] ss:$16 sps:$4 sm:$0xff]   ;;  %v3526_v13 = vld [vmem:[%s5034_s5 + $0x2c] ss:$16 sps:$4 sm:$0xff]  }
  0x1f   : > { %575 = vmatprep.subr.bf16.mxu1 %v3476_v18  ;;  %v3553_v52 = vld [vmem:[%s5034_s5 + $0x184] ss:$16 sps:$4 sm:$0xff]   ;;  %v3551_v53 = vld [vmem:[%s5034_s5 + $0x180] ss:$16 sps:$4 sm:$0xff]   ;;  %v3524_v14 = vld [vmem:[%s5034_s5 + $0x28] ss:$16 sps:$4 sm:$0xff]  }
  0x20   : > { %v3559_v54 = vld [vmem:[%s5034_s5 + $0x164] ss:$16 sps:$4 sm:$0xff]   ;;  %v3557_v55 = vld [vmem:[%s5034_s5 + $0x160] ss:$16 sps:$4 sm:$0xff]   ;;  %v3532_v15 = vld [vmem:[%s5034_s5 + $0xc] ss:$16 sps:$4 sm:$0xff]  }
  0x21   : > { %3432 = vmatpush3.bf16.msra.mxu0 %v3458_v12  ;;  %v3037_v56 = vld [vmem:[%s5031_s2] ss:$0 sm:$0xff]  ;;  %v3518_v12 = vld [vmem:[%s5034_s5 + $0x48] ss:$16 sps:$4 sm:$0xff]   ;;  %v3538_v17 = vld [vmem:[%s5034_s5 + $0x1ec] ss:$16 sps:$4 sm:$0xff]  }
  0x22   : > { %3433 = vmatprep.subr.bf16.mxu0 %v3937_v1  ;;  %576 = vmatpush1.bf16.msra.mxu1 %v3478_v23  ;;  %v3536_v18 = vld [vmem:[%s5034_s5 + $0x1e8] ss:$16 sps:$4 sm:$0xff]   ;;  %v3550_v21 = vld [vmem:[%s5034_s5 + $0x1ac] ss:$16 sps:$4 sm:$0xff]  }
  0x23   : > { %577 = vmatprep.subr.bf16.mxu1 %v3479_v24  ;;  %v3542_v20 = vld [vmem:[%s5034_s5 + $0x1c8] ss:$16 sps:$4 sm:$0xff]   ;;  %v3556_v23 = vld [vmem:[%s5034_s5 + $0x18c] ss:$16 sps:$4 sm:$0xff]  }
  0x24   : > { %v3554_v24 = vld [vmem:[%s5034_s5 + $0x188] ss:$16 sps:$4 sm:$0xff]   ;;  %v3568_v28 = vld [vmem:[%s5034_s5 + $0x14c] ss:$16 sps:$4 sm:$0xff]  }
  0x25   : > { %3434 = vmatpush3.bf16.msra.mxu0 %v3459_v16  ;;  %v3530_v16 = vld [vmem:[%s5034_s5 + $0x8] ss:$16 sps:$4 sm:$0xff]  }
  0x26   : > { %3435 = vmatprep.subr.bf16.mxu0 %v3937_v1  ;;  %578 = vmatpush1.bf16.msra.mxu1 %v3481_v25  ;;  %v3488_v1 = vld [vmem:[%s5034_s5 + $0xe8] ss:$16 sps:$4 sm:$0xff]   ;;  %v3562_v25 = vld [vmem:[%s5034_s5 + $0x16c] ss:$16 sps:$4 sm:$0xff]  }
  0x27   : > { %579 = vmatprep.subr.bf16.mxu1 %v3482_v26  ;;  %v3560_v26 = vld [vmem:[%s5034_s5 + $0x168] ss:$16 sps:$4 sm:$0xff]  }
  0x29   : > { %3436 = vmatpush3.bf16.msra.mxu0 %v3460_v19  ;;  %v3544_v19 = vld [vmem:[%s5034_s5 + $0x1cc] ss:$16 sps:$4 sm:$0xff]  }
  0x2a   : > { %580 = vmatpush1.bf16.msra.mxu1 %v3484_v27  ;;  %1020 = vmatprep.subr.bf16.mxu0 %v3487_v30  ;;  %v3565_v27 = vld [vmem:[%s5034_s5 + $0x144] ss:$16 sps:$4 sm:$0xff]   ;;  %v3566_v30 = vld [vmem:[%s5034_s5 + $0x148] ss:$16 sps:$4 sm:$0xff]  }
  0x2b   : > { %1063 = vmatprep.subr.bf16.mxu1 %v3490_v31  ;;  %v3571_v31 = vld [vmem:[%s5034_s5 + $0x124] ss:$16 sps:$4 sm:$0xff]  }
  0x2c   : > { %3438 = vmatmul.mubr.bf16.vlgmr.msra.gmra.mxu0 %v341_v22  ;;  %v3548_v22 = vld [vmem:[%s5034_s5 + $0x1a8] ss:$16 sps:$4 sm:$0xff]  }
  0x2d   : > { %1021 = vmatpush1.bf16.msra.mxu0 %v3485_v29  ;;  %v3563_v29 = vld [vmem:[%s5034_s5 + $0x140] ss:$16 sps:$4 sm:$0xff]  }
  0x2e   : > { %1022 = vmatprep.subr.bf16.mxu0 %v3493_v32  ;;  %v3574_v32 = vld [vmem:[%s5034_s5 + $0x12c] ss:$16 sps:$4 sm:$0xff]  }
  0x31   : > { %1023 = vmatpush1.bf16.msra.mxu0 %v3491_v33  ;;  %v3569_v33 = vld [vmem:[%s5034_s5 + $0x120] ss:$16 sps:$4 sm:$0xff]  }
  0x32   : > { %1024 = vmatprep.subr.bf16.mxu0 %v3499_v34  ;;  %v3572_v34 = vld [vmem:[%s5034_s5 + $0x128] ss:$16 sps:$4 sm:$0xff]  }
  0x35   : > { %1025 = vmatpush1.bf16.msra.mxu0 %v3497_v35  ;;  %v3577_v35 = vld [vmem:[%s5034_s5 + $0x104] ss:$16 sps:$4 sm:$0xff]  }
  0x36   : > { %1026 = vmatprep.subr.bf16.mxu0 %v3505_v36  ;;  %v3580_v36 = vld [vmem:[%s5034_s5 + $0x10c] ss:$16 sps:$4 sm:$0xff]  }
  0x39   : > { %1027 = vmatpush1.bf16.msra.mxu0 %v3503_v37  ;;  %v3575_v37 = vld [vmem:[%s5034_s5 + $0x100] ss:$16 sps:$4 sm:$0xff]  }
  0x3a   : > { %1028 = vmatprep.subr.bf16.mxu0 %v3511_v38  ;;  %v3578_v38 = vld [vmem:[%s5034_s5 + $0x108] ss:$16 sps:$4 sm:$0xff]  }
  0x3d   : > { %1029 = vmatpush1.bf16.msra.mxu0 %v3509_v39  ;;  %v3583_v39 = vld [vmem:[%s5036_s7 + $0x18c] ss:$28 sps:$4 sm:$0xff]  }
  0x3e   : > { %1030 = vmatprep.subr.bf16.mxu0 %v3517_v40  ;;  %v3586_v40 = vld [vmem:[%s5036_s7 + $0x50c] ss:$28 sps:$4 sm:$0xff]  }
  0x41   : > { %1031 = vmatpush1.bf16.msra.mxu0 %v3515_v41  ;;  %v475_v41 = vlaneseq }
  0x42   : > { %1032 = vmatprep.subr.bf16.mxu0 %v3523_v42 }
  0x43   : > { %v4277_v42 = vshrl.u32 %v475_v41, 7  ;;  %v3652_v41 = vld [vmem:[%s5036_s7 + $0x624] ss:$28 sps:$4 sm:$0xff]  }
  0x45   : > { %1033 = vmatpush1.bf16.msra.mxu0 %v3521_v43  ;;  %v4280_v43 = vsub.s32 1, %v4277_v42 }
  0x46   : > { %1034 = vmatprep.subr.bf16.mxu0 %v3529_v44  ;;  %v4283_v44 = vsub.s32 0, %v4277_v42 }
  0x49   : > { %1035 = vmatpush1.bf16.msra.mxu0 %v3527_v45  ;;  %v473_v45 = vld [vmem:[%s5033_s4] sm:$0x3] }
  0x4a   : > { %1036 = vmatprep.subr.bf16.mxu0 %v3535_v46 }
  0x4d   : > { %1037 = vmatpush2.bf16.msra.mxu0 %v3533_v47  ;;  %v482_v47 = vrot.slane %v473_v45, %v4280_v43 }
  0x4e   : > { %1038 = vmatprep.subr.bf16.mxu0 %v3541_v48  ;;  %v478_v48 = vrot.slane %v473_v45, %v4283_v44  ;;  %v3647_v45 = vld [vmem:[%s5036_s7 + $0x2a0] ss:$28 sps:$4 sm:$0xff]  }
  0x51   : > { %1039 = vmatpush2.bf16.msra.mxu0 %v3539_v49 }
  0x52   : > { %1040 = vmatprep.subr.bf16.mxu0 %v3547_v50 }
  0x55   : > { %1041 = vmatpush2.bf16.msra.mxu0 %v3545_v51 }
  0x56   : > { %1042 = vmatprep.subr.bf16.mxu0 %v3553_v52 }
  0x59   : > { %1043 = vmatpush2.bf16.msra.mxu0 %v3551_v53 }
  0x5a   : > { %1044 = vmatprep.subr.bf16.mxu0 %v3559_v54 }
  0x5d   : > { %1045 = vmatpush2.bf16.msra.mxu0 %v3557_v55 }
  0x5e   : > { %1046 = vmatprep.subr.bf16.mxu0 %v3565_v27  ;;  %v3626_v27 = vld [vmem:[%s5036_s7 + $0x380] ss:$28 sps:$4 sm:$0xff]  }
  0x61   : > { %1047 = vmatpush2.bf16.msra.mxu0 %v3563_v29  ;;  %v3634_v29 = vld [vmem:[%s5036_s7 + $0x6cc] ss:$28 sps:$4 sm:$0xff]  }
  0x62   : > { %1048 = vmatprep.subr.bf16.mxu0 %v3571_v31  ;;  %v3632_v31 = vld [vmem:[%s5036_s7 + $0x6c8] ss:$28 sps:$4 sm:$0xff]  }
  0x65   : > { %1049 = vmatpush2.bf16.msra.mxu0 %v3569_v33  ;;  %v3640_v33 = vld [vmem:[%s5036_s7 + $0x694] ss:$28 sps:$4 sm:$0xff]  }
  0x66   : > { %1050 = vmatprep.subr.bf16.mxu0 %v3577_v35  ;;  %v3638_v35 = vld [vmem:[%s5036_s7 + $0x690] ss:$28 sps:$4 sm:$0xff]  }
  0x69   : > { %1051 = vmatpush2.bf16.msra.mxu0 %v3575_v37  ;;  %v3646_v37 = vld [vmem:[%s5036_s7 + $0x65c] ss:$28 sps:$4 sm:$0xff]  }
  0x6a   : > { %2563 = vmatprep.subr.bf16.mxu0 %v3583_v39  ;;  %v3644_v39 = vld [vmem:[%s5036_s7 + $0x658] ss:$28 sps:$4 sm:$0xff]  }
  0xec   : > { %v447_v57 = vpop.f32.mrf.mxu0 }
  0xed   : > { %v448_v59 = vadd.f32 %v3037_v56, %v447_v57 }
  0xee   : > { %v3439_v58 = vpop.f32.mrf.mxu0 }
  0xef   : > { %v454_v63 = vmax.f32 %v448_v59, 0.0 }
  0xf0   : > { %v450_v60 = vpop.f32.mrf.mxu0 }
  0xf1   : > { %v451_v61 = vadd.f32 %v3037_v56, %v450_v60 }
  0xf2   : > { %v3440_v62 = vpop.f32.mrf.mxu0 }
  0xf3   : > { %v455_v0 = vmax.f32 %v451_v61, 0.0  ;;  %v3581_v61 = vld [vmem:[%s5036_s7 + $0x188] ss:$28 sps:$4 sm:$0xff]  }
  0xf4   : > { %v3584_v62 = vld [vmem:[%s5036_s7 + $0x508] ss:$28 sps:$4 sm:$0xff]  }
  0xf5   : > { %v456_v2 = vpack.c.bf16 %v455_v0, %v454_v63  ;;  %v3589_v0 = vld [vmem:[%s5036_s7 + $0x154] ss:$28 sps:$4 sm:$0xff]  }
  0xf7   : > { %598 = vmatmul.mubr.bf16.vlgmr.msra.gmra.mxu1 %v456_v2  ;;  %v3587_v2 = vld [vmem:[%s5036_s7 + $0x150] ss:$28 sps:$4 sm:$0xff]  }
  0xf8   : > { %1064 = vmatpush1.bf16.msra.mxu1 %v3488_v1  ;;  %v3592_v1 = vld [vmem:[%s5036_s7 + $0x4d4] ss:$28 sps:$4 sm:$0xff]  }
  0xf9   : > { %1065 = vmatprep.subr.bf16.mxu1 %v3496_v3  ;;  %v3590_v3 = vld [vmem:[%s5036_s7 + $0x4d0] ss:$28 sps:$4 sm:$0xff]  }
  0xfc   : > { %1066 = vmatpush1.bf16.msra.mxu1 %v3494_v4  ;;  %v3595_v4 = vld [vmem:[%s5036_s7 + $0x11c] ss:$28 sps:$4 sm:$0xff]  }
  0xfd   : > { %1067 = vmatprep.subr.bf16.mxu1 %v3502_v5  ;;  %v3598_v5 = vld [vmem:[%s5036_s7 + $0x49c] ss:$28 sps:$4 sm:$0xff]  }
 0x100   : > { %1068 = vmatpush1.bf16.msra.mxu1 %v3500_v6  ;;  %v3593_v6 = vld [vmem:[%s5036_s7 + $0x118] ss:$28 sps:$4 sm:$0xff]  }
 0x101   : > { %1069 = vmatprep.subr.bf16.mxu1 %v3508_v7  ;;  %v3596_v7 = vld [vmem:[%s5036_s7 + $0x498] ss:$28 sps:$4 sm:$0xff]  }
 0x104   : > { %1070 = vmatpush1.bf16.msra.mxu1 %v3506_v8  ;;  %v3601_v8 = vld [vmem:[%s5036_s7 + $0xe4] ss:$28 sps:$4 sm:$0xff]  }
 0x105   : > { %1071 = vmatprep.subr.bf16.mxu1 %v3514_v9  ;;  %v3604_v9 = vld [vmem:[%s5036_s7 + $0x464] ss:$28 sps:$4 sm:$0xff]  }
 0x108   : > { %1072 = vmatpush1.bf16.msra.mxu1 %v3512_v10  ;;  %v3599_v10 = vld [vmem:[%s5036_s7 + $0xe0] ss:$28 sps:$4 sm:$0xff]  }
 0x109   : > { %1073 = vmatprep.subr.bf16.mxu1 %v3520_v11  ;;  %v3602_v11 = vld [vmem:[%s5036_s7 + $0x460] ss:$28 sps:$4 sm:$0xff]  }
 0x10c   : > { %1074 = vmatpush1.bf16.msra.mxu1 %v3518_v12  ;;  %v3607_v12 = vld [vmem:[%s5036_s7 + $0xac] ss:$28 sps:$4 sm:$0xff]  }
 0x10d   : > { %1075 = vmatprep.subr.bf16.mxu1 %v3526_v13  ;;  %v3610_v13 = vld [vmem:[%s5036_s7 + $0x42c] ss:$28 sps:$4 sm:$0xff]  }
 0x110   : > { %1076 = vmatpush1.bf16.msra.mxu1 %v3524_v14  ;;  %v3605_v14 = vld [vmem:[%s5036_s7 + $0xa8] ss:$28 sps:$4 sm:$0xff]  }
 0x111   : > { %1077 = vmatprep.subr.bf16.mxu1 %v3532_v15  ;;  %v3608_v15 = vld [vmem:[%s5036_s7 + $0x428] ss:$28 sps:$4 sm:$0xff]  }
 0x114   : > { %1078 = vmatpush1.bf16.msra.mxu1 %v3530_v16  ;;  %v3613_v16 = vld [vmem:[%s5036_s7 + $0x74] ss:$28 sps:$4 sm:$0xff]  }
 0x115   : > { %1079 = vmatprep.subr.bf16.mxu1 %v3538_v17  ;;  %v3616_v17 = vld [vmem:[%s5036_s7 + $0x3f4] ss:$28 sps:$4 sm:$0xff]  }
 0x118   : > { %1080 = vmatpush2.bf16.msra.mxu1 %v3536_v18  ;;  %v3611_v18 = vld [vmem:[%s5036_s7 + $0x70] ss:$28 sps:$4 sm:$0xff]  }
 0x119   : > { %1081 = vmatprep.subr.bf16.mxu1 %v3544_v19  ;;  %v3614_v19 = vld [vmem:[%s5036_s7 + $0x3f0] ss:$28 sps:$4 sm:$0xff]  }
 0x11c   : > { %1082 = vmatpush2.bf16.msra.mxu1 %v3542_v20  ;;  %v3619_v20 = vld [vmem:[%s5036_s7 + $0x3c] ss:$28 sps:$4 sm:$0xff]  }
 0x11d   : > { %1083 = vmatprep.subr.bf16.mxu1 %v3550_v21  ;;  %v3622_v21 = vld [vmem:[%s5036_s7 + $0x3bc] ss:$28 sps:$4 sm:$0xff]  }
 0x120   : > { %1084 = vmatpush2.bf16.msra.mxu1 %v3548_v22  ;;  %v3617_v22 = vld [vmem:[%s5036_s7 + $0x38] ss:$28 sps:$4 sm:$0xff]  }
 0x121   : > { %1085 = vmatprep.subr.bf16.mxu1 %v3556_v23  ;;  %v3620_v23 = vld [vmem:[%s5036_s7 + $0x3b8] ss:$28 sps:$4 sm:$0xff]  }
 0x124   : > { %1086 = vmatpush2.bf16.msra.mxu1 %v3554_v24  ;;  %v3625_v24 = vld [vmem:[%s5036_s7 + $0x4] ss:$28 sps:$4 sm:$0xff]  }
 0x125   : > { %1087 = vmatprep.subr.bf16.mxu1 %v3562_v25  ;;  %v3628_v25 = vld [vmem:[%s5036_s7 + $0x384] ss:$28 sps:$4 sm:$0xff]  }
 0x128   : > { %1088 = vmatpush2.bf16.msra.mxu1 %v3560_v26  ;;  %v3623_v26 = vld [vmem:[%s5036_s7] ss:$28 sps:$4 sm:$0xff]  }
 0x129   : > { %1089 = vmatprep.subr.bf16.mxu1 %v3568_v28  ;;  %v3631_v28 = vld [vmem:[%s5036_s7 + $0x34c] ss:$28 sps:$4 sm:$0xff]  }
 0x12c   : > { %1090 = vmatpush2.bf16.msra.mxu1 %v3566_v30  ;;  %v3629_v30 = vld [vmem:[%s5036_s7 + $0x348] ss:$28 sps:$4 sm:$0xff]  }
 0x12d   : > { %1091 = vmatprep.subr.bf16.mxu1 %v3574_v32  ;;  %v3637_v32 = vld [vmem:[%s5036_s7 + $0x314] ss:$28 sps:$4 sm:$0xff]  }
 0x130   : > { %1092 = vmatpush2.bf16.msra.mxu1 %v3572_v34  ;;  %v3635_v34 = vld [vmem:[%s5036_s7 + $0x310] ss:$28 sps:$4 sm:$0xff]  }
 0x131   : > { %1093 = vmatprep.subr.bf16.mxu1 %v3580_v36  ;;  %v3643_v36 = vld [vmem:[%s5036_s7 + $0x2dc] ss:$28 sps:$4 sm:$0xff]  }
 0x134   : > { %1094 = vmatpush2.bf16.msra.mxu1 %v3578_v38  ;;  %v3641_v38 = vld [vmem:[%s5036_s7 + $0x2d8] ss:$28 sps:$4 sm:$0xff]  }
 0x135   : > { %2606 = vmatprep.subr.bf16.mxu1 %v3586_v40  ;;  %v3649_v40 = vld [vmem:[%s5036_s7 + $0x2a4] ss:$28 sps:$4 sm:$0xff]  }
 0x1b7   : > { %v599_v46 = vpop.f32.mrf.mxu1 }
 0x1b8   : > { %v600_v53 = vadd.f32 %v599_v46, %v478_v48  ;;  %v3650_v46 = vld [vmem:[%s5036_s7 + $0x620] ss:$28 sps:$4 sm:$0xff]  }
 0x1b9   : > { %v601_v49 = vpop.f32.mrf.mxu1 }
 0x1ba   : > { %v602_v51 = vadd.f32 %v601_v49, %v482_v47  ;;  %v608_v59 = vmax.f32 %v600_v53, 0.0  ;;  %v3653_v49 = vld [vmem:[%s5036_s7 + $0x268] ss:$28 sps:$4 sm:$0xff]   ;;  %v3659_v53 = vld [vmem:[%s5036_s7 + $0x230] ss:$28 sps:$4 sm:$0xff]  }
 0x1bb   : > { %v603_v50 = vpop.f32.mrf.mxu1 }
 0x1bc   : > { %v604_v52 = vadd.f32 %v603_v50, %v478_v48  ;;  %v609_v57 = vmax.f32 %v602_v51, 0.0  ;;  %v3658_v48 = vld [vmem:[%s5036_s7 + $0x5ec] ss:$28 sps:$4 sm:$0xff]   ;;  %v3661_v51 = vld [vmem:[%s5036_s7 + $0x234] ss:$28 sps:$4 sm:$0xff]  }
 0x1bd   : > { %v605_v54 = vpop.f32.mrf.mxu1  ;;  %v3656_v50 = vld [vmem:[%s5036_s7 + $0x5e8] ss:$28 sps:$4 sm:$0xff]  }
 0x1be   : > { %v606_v55 = vadd.f32 %v605_v54, %v482_v47  ;;  %v610_v56 = vmax.f32 %v604_v52, 0.0  ;;  %v3655_v47 = vld [vmem:[%s5036_s7 + $0x26c] ss:$28 sps:$4 sm:$0xff]   ;;  %v3664_v52 = vld [vmem:[%s5036_s7 + $0x5b4] ss:$28 sps:$4 sm:$0xff]  }
 0x1bf   : > { %v3662_v54 = vld [vmem:[%s5036_s7 + $0x5b0] ss:$28 sps:$4 sm:$0xff]  }
 0x1c0   : > { %v611_v58 = vmax.f32 %v606_v55, 0.0  ;;  %v612_v63 = vpack.c.bf16 %v610_v56, %v608_v59  ;;  %v3667_v55 = vld [vmem:[%s5036_s7 + $0x1fc] ss:$28 sps:$4 sm:$0xff]   ;;  %v3673_v59 = vld [vmem:[%s5036_s7 + $0x1c4] ss:$28 sps:$4 sm:$0xff]  }
 0x1c1   : > { %v3670_v56 = vld [vmem:[%s5036_s7 + $0x57c] ss:$28 sps:$4 sm:$0xff]  }
 0x1c2   : > { %v613_v60 = vpack.c.bf16 %v611_v58, %v609_v57  ;;  %v3665_v57 = vld [vmem:[%s5036_s7 + $0x1f8] ss:$28 sps:$4 sm:$0xff]  }
 0x1c3   : > { %v3668_v58 = vld [vmem:[%s5036_s7 + $0x578] ss:$28 sps:$4 sm:$0xff]  }
 0x1c4   : > { %1052 = vmatprep.mubr.bf16.mxu0 %v613_v60  ;;  %1095 = vmatprep.mubr.bf16.mxu1 %v613_v60  ;;  %v3676_v60 = vld [vmem:[%s5036_s7 + $0x544] ss:$28 sps:$4 sm:$0xff]  }
 0x1c5   : > { %1053 = vmatmul.mubr.bf16.vlgmr.msra.gmra.mxu0 %v612_v63  ;;  %1096 = vmatmul.mubr.bf16.vlgmr.msra.gmra.mxu1 %v612_v63  ;;  %v3679_v63 = vld [vmem:[%s5036_s7 + $0x194] ss:$28 sps:$4 sm:$0xff]  }
 0x1c6   : > { %2564 = vmatpush1.bf16.msra.mxu0 %v3581_v61  ;;  %2607 = vmatpush1.bf16.msra.mxu1 %v3584_v62  ;;  %v3671_v61 = vld [vmem:[%s5036_s7 + $0x1c0] ss:$28 sps:$4 sm:$0xff]  }
 0x1c7   : > { %2565 = vmatprep.subr.bf16.mxu0 %v3589_v0  ;;  %2608 = vmatprep.subr.bf16.mxu1 %v3592_v1  ;;  %v3674_v62 = vld [vmem:[%s5036_s7 + $0x540] ss:$28 sps:$4 sm:$0xff]   ;;  %v3682_v0 = vld [vmem:[%s5036_s7 + $0x514] ss:$28 sps:$4 sm:$0xff]   ;;  %v694_v1 = vsub.s32 3, %v4277_v42 }
 0x1ca   : > { %2566 = vmatpush1.bf16.msra.mxu0 %v3587_v2  ;;  %2609 = vmatpush1.bf16.msra.mxu1 %v3590_v3  ;;  %v690_v2 = vsub.s32 2, %v4277_v42  ;;  %v678_v3 = vld [vmem:[%s5035_s6] sm:$0xf] }
 0x1cb   : > { %2567 = vmatprep.subr.bf16.mxu0 %v3595_v4  ;;  %2610 = vmatprep.subr.bf16.mxu1 %v3598_v5 }
 0x1ce   : > { %2568 = vmatpush1.bf16.msra.mxu0 %v3593_v6  ;;  %2611 = vmatpush1.bf16.msra.mxu1 %v3596_v7  ;;  %v687_v6 = vrot.slane %v678_v3, %v4280_v43  ;;  %v695_v7 = vrot.slane %v678_v3, %v694_v1 }
 0x1cf   : > { %2569 = vmatprep.subr.bf16.mxu0 %v3601_v8  ;;  %2612 = vmatprep.subr.bf16.mxu1 %v3604_v9  ;;  %v683_v8 = vrot.slane %v678_v3, %v4283_v44  ;;  %v691_v9 = vrot.slane %v678_v3, %v690_v2  ;;  %v3721_v3 = vld [vmem:[%s5036_s7 + $0xc] ss:$28 sps:$4 sm:$0xff]  }
 0x1d2   : > { %2570 = vmatpush1.bf16.msra.mxu0 %v3599_v10  ;;  %2613 = vmatpush1.bf16.msra.mxu1 %v3602_v11 }
 0x1d3   : > { %2571 = vmatprep.subr.bf16.mxu0 %v3607_v12  ;;  %2614 = vmatprep.subr.bf16.mxu1 %v3610_v13 }
 0x1d6   : > { %2572 = vmatpush1.bf16.msra.mxu0 %v3605_v14  ;;  %2615 = vmatpush1.bf16.msra.mxu1 %v3608_v15 }
 0x1d7   : > { %2573 = vmatprep.subr.bf16.mxu0 %v3613_v16  ;;  %2616 = vmatprep.subr.bf16.mxu1 %v3616_v17 }
 0x1da   : > { %2574 = vmatpush1.bf16.msra.mxu0 %v3611_v18  ;;  %2617 = vmatpush1.bf16.msra.mxu1 %v3614_v19 }
 0x1db   : > { %2575 = vmatprep.subr.bf16.mxu0 %v3619_v20  ;;  %2618 = vmatprep.subr.bf16.mxu1 %v3622_v21 }
 0x1de   : > { %2576 = vmatpush1.bf16.msra.mxu0 %v3617_v22  ;;  %2619 = vmatpush1.bf16.msra.mxu1 %v3620_v23 }
 0x1df   : > { %2577 = vmatprep.subr.bf16.mxu0 %v3625_v24  ;;  %2620 = vmatprep.subr.bf16.mxu1 %v3628_v25 }
 0x1e2   : > { %2578 = vmatpush1.bf16.msra.mxu0 %v3623_v26  ;;  %2621 = vmatpush1.bf16.msra.mxu1 %v3626_v27 }
 0x1e3   : > { %2579 = vmatprep.subr.bf16.mxu0 %v3631_v28  ;;  %2622 = vmatprep.subr.bf16.mxu1 %v3634_v29 }
 0x1e6   : > { %2580 = vmatpush2.bf16.msra.mxu0 %v3629_v30  ;;  %2623 = vmatpush2.bf16.msra.mxu1 %v3632_v31 }
 0x1e7   : > { %2581 = vmatprep.subr.bf16.mxu0 %v3637_v32  ;;  %2624 = vmatprep.subr.bf16.mxu1 %v3640_v33 }
 0x1ea   : > { %2582 = vmatpush2.bf16.msra.mxu0 %v3635_v34  ;;  %2625 = vmatpush2.bf16.msra.mxu1 %v3638_v35  ;;  %v3677_v34 = vld [vmem:[%s5036_s7 + $0x190] ss:$28 sps:$4 sm:$0xff]  }
 0x1eb   : > { %2583 = vmatprep.subr.bf16.mxu0 %v3643_v36  ;;  %2626 = vmatprep.subr.bf16.mxu1 %v3646_v37  ;;  %v3680_v35 = vld [vmem:[%s5036_s7 + $0x510] ss:$28 sps:$4 sm:$0xff]  }
 0x1ee   : > { %2584 = vmatpush2.bf16.msra.mxu0 %v3641_v38  ;;  %2627 = vmatpush2.bf16.msra.mxu1 %v3644_v39  ;;  %v3685_v38 = vld [vmem:[%s5036_s7 + $0x15c] ss:$28 sps:$4 sm:$0xff]  }
 0x1ef   : > { %2585 = vmatprep.subr.bf16.mxu0 %v3649_v40  ;;  %2628 = vmatprep.subr.bf16.mxu1 %v3652_v41  ;;  %v3688_v39 = vld [vmem:[%s5036_s7 + $0x4dc] ss:$28 sps:$4 sm:$0xff]  }
 0x1f0   : > { %v3683_v40 = vld [vmem:[%s5036_s7 + $0x158] ss:$28 sps:$4 sm:$0xff]  }
 0x1f1   : > { %v3686_v41 = vld [vmem:[%s5036_s7 + $0x4d8] ss:$28 sps:$4 sm:$0xff]  }
 0x1f2   : > { %2586 = vmatpush2.bf16.msra.mxu0 %v3647_v45  ;;  %2629 = vmatpush2.bf16.msra.mxu1 %v3650_v46  ;;  %v3691_v45 = vld [vmem:[%s5036_s7 + $0x124] ss:$28 sps:$4 sm:$0xff]  }
 0x1f3   : > { %2587 = vmatprep.subr.bf16.mxu0 %v3655_v47  ;;  %2630 = vmatprep.subr.bf16.mxu1 %v3658_v48  ;;  %v3694_v46 = vld [vmem:[%s5036_s7 + $0x4a4] ss:$28 sps:$4 sm:$0xff]  }
 0x1f4   : > { %v3689_v47 = vld [vmem:[%s5036_s7 + $0x120] ss:$28 sps:$4 sm:$0xff]  }
 0x1f5   : > { %v3692_v48 = vld [vmem:[%s5036_s7 + $0x4a0] ss:$28 sps:$4 sm:$0xff]  }
 0x1f6   : > { %2588 = vmatpush2.bf16.msra.mxu0 %v3653_v49  ;;  %2631 = vmatpush2.bf16.msra.mxu1 %v3656_v50  ;;  %v3697_v49 = vld [vmem:[%s5036_s7 + $0xec] ss:$28 sps:$4 sm:$0xff]  }
 0x1f7   : > { %2589 = vmatprep.subr.bf16.mxu0 %v3661_v51  ;;  %2632 = vmatprep.subr.bf16.mxu1 %v3664_v52  ;;  %v3700_v50 = vld [vmem:[%s5036_s7 + $0x46c] ss:$28 sps:$4 sm:$0xff]  }
 0x1f8   : > { %v3695_v51 = vld [vmem:[%s5036_s7 + $0xe8] ss:$28 sps:$4 sm:$0xff]  }
 0x1f9   : > { %v3698_v52 = vld [vmem:[%s5036_s7 + $0x468] ss:$28 sps:$4 sm:$0xff]  }
 0x1fa   : > { %2590 = vmatpush2.bf16.msra.mxu0 %v3659_v53  ;;  %2633 = vmatpush2.bf16.msra.mxu1 %v3662_v54  ;;  %v3703_v53 = vld [vmem:[%s5036_s7 + $0xb4] ss:$28 sps:$4 sm:$0xff]  }
 0x1fb   : > { %2591 = vmatprep.subr.bf16.mxu0 %v3667_v55  ;;  %2634 = vmatprep.subr.bf16.mxu1 %v3670_v56  ;;  %v3706_v54 = vld [vmem:[%s5036_s7 + $0x434] ss:$28 sps:$4 sm:$0xff]  }
 0x1fc   : > { %v3701_v55 = vld [vmem:[%s5036_s7 + $0xb0] ss:$28 sps:$4 sm:$0xff]  }
 0x1fd   : > { %v3704_v56 = vld [vmem:[%s5036_s7 + $0x430] ss:$28 sps:$4 sm:$0xff]  }
 0x1fe   : > { %2592 = vmatpush2.bf16.msra.mxu0 %v3665_v57  ;;  %2635 = vmatpush2.bf16.msra.mxu1 %v3668_v58  ;;  %v3709_v57 = vld [vmem:[%s5036_s7 + $0x7c] ss:$28 sps:$4 sm:$0xff]  }
 0x1ff   : > { %2593 = vmatprep.subr.bf16.mxu0 %v3673_v59  ;;  %2636 = vmatprep.subr.bf16.mxu1 %v3676_v60  ;;  %v3712_v58 = vld [vmem:[%s5036_s7 + $0x3fc] ss:$28 sps:$4 sm:$0xff]  }
 0x200   : > { %v3707_v59 = vld [vmem:[%s5036_s7 + $0x78] ss:$28 sps:$4 sm:$0xff]  }
 0x201   : > { %v3710_v60 = vld [vmem:[%s5036_s7 + $0x3f8] ss:$28 sps:$4 sm:$0xff]  }
 0x202   : > { %2594 = vmatpush2.bf16.msra.mxu0 %v3671_v61  ;;  %2637 = vmatpush2.bf16.msra.mxu1 %v3674_v62  ;;  %v3715_v61 = vld [vmem:[%s5036_s7 + $0x44] ss:$28 sps:$4 sm:$0xff]  }
 0x203   : > { %2649 = vmatprep.subr.bf16.mxu0 %v3679_v63  ;;  %2692 = vmatprep.subr.bf16.mxu1 %v3682_v0  ;;  %v3718_v62 = vld [vmem:[%s5036_s7 + $0x3c4] ss:$28 sps:$4 sm:$0xff]  }
 0x204   : > { %v3713_v63 = vld [vmem:[%s5036_s7 + $0x40] ss:$28 sps:$4 sm:$0xff]  }
 0x205   : > { %v3716_v0 = vld [vmem:[%s5036_s7 + $0x3c0] ss:$28 sps:$4 sm:$0xff]  }
 0x285   : > { %v1054_v4 = vpop.f32.mrf.mxu0  ;;  %v1097_v5 = vpop.f32.mrf.mxu1 }
 0x286   : > { %v1055_v18 = vadd.f32 %v1054_v4, %v683_v8  ;;  %v1098_v19 = vadd.f32 %v1097_v5, %v691_v9  ;;  %v3724_v4 = vld [vmem:[%s5036_s7 + $0x38c] ss:$28 sps:$4 sm:$0xff]  }
 0x287   : > { %v1056_v10 = vpop.f32.mrf.mxu0  ;;  %v1099_v11 = vpop.f32.mrf.mxu1  ;;  %v3719_v5 = vld [vmem:[%s5036_s7 + $0x8] ss:$28 sps:$4 sm:$0xff]  }
 0x288   : > { %v1057_v14 = vadd.f32 %v1056_v10, %v687_v6  ;;  %v1100_v15 = vadd.f32 %v1099_v11, %v695_v7  ;;  %v1106_v30 = vmax.f32 %v1055_v18, 0.0  ;;  %v1108_v31 = vmax.f32 %v1098_v19, 0.0  ;;  %v3728_v10 = vld [vmem:[%s5036_s7 + $0x6d0] ss:$28 sps:$4 sm:$0xff]   ;;  %v3733_v11 = vld [vmem:[%s5036_s7 + $0x31c] ss:$28 sps:$4 sm:$0xff]  }
 0x289   : > { %v1058_v12 = vpop.f32.mrf.mxu0  ;;  %v1101_v13 = vpop.f32.mrf.mxu1  ;;  %v3740_v18 = vld [vmem:[%s5036_s7 + $0x660] ss:$28 sps:$4 sm:$0xff]   ;;  %v3745_v19 = vld [vmem:[%s5036_s7 + $0x2ac] ss:$28 sps:$4 sm:$0xff]  }
 0x28a   : > { %v1059_v16 = vadd.f32 %v1058_v12, %v683_v8  ;;  %v1102_v17 = vadd.f32 %v1101_v13, %v691_v9  ;;  %v1107_v26 = vmax.f32 %v1057_v14, 0.0  ;;  %v1109_v27 = vmax.f32 %v1100_v15, 0.0  ;;  %v3730_v8 = vld [vmem:[%s5036_s7 + $0x6d4] ss:$28 sps:$4 sm:$0xff]   ;;  %v3736_v12 = vld [vmem:[%s5036_s7 + $0x69c] ss:$28 sps:$4 sm:$0xff]  }
 0x28b   : > { %v1060_v20 = vpop.f32.mrf.mxu0  ;;  %v1103_v21 = vpop.f32.mrf.mxu1  ;;  %v3725_v9 = vld [vmem:[%s5036_s7 + $0x350] ss:$28 sps:$4 sm:$0xff]   ;;  %v3731_v13 = vld [vmem:[%s5036_s7 + $0x318] ss:$28 sps:$4 sm:$0xff]   ;;  %v3739_v15 = vld [vmem:[%s5036_s7 + $0x2e4] ss:$28 sps:$4 sm:$0xff]  }
 0x28c   : > { %v1061_v22 = vadd.f32 %v1060_v20, %v687_v6  ;;  %v1104_v23 = vadd.f32 %v1103_v21, %v695_v7  ;;  %v1110_v24 = vmax.f32 %v1059_v16, 0.0  ;;  %v1112_v25 = vmax.f32 %v1102_v17, 0.0  ;;  %v3722_v6 = vld [vmem:[%s5036_s7 + $0x388] ss:$28 sps:$4 sm:$0xff]   ;;  %v3727_v7 = vld [vmem:[%s5036_s7 + $0x354] ss:$28 sps:$4 sm:$0xff]  }
 0x28d   : > { %v3734_v14 = vld [vmem:[%s5036_s7 + $0x698] ss:$28 sps:$4 sm:$0xff]   ;;  %v3742_v16 = vld [vmem:[%s5036_s7 + $0x664] ss:$28 sps:$4 sm:$0xff]   ;;  %v3748_v20 = vld [vmem:[%s5036_s7 + $0x62c] ss:$28 sps:$4 sm:$0xff]  }
 0x28e   : > { %v1111_v28 = vmax.f32 %v1061_v22, 0.0  ;;  %v1113_v29 = vmax.f32 %v1104_v23, 0.0  ;;  %v4503_v36 = vpack.c.bf16 %v1110_v24, %v1106_v30  ;;  %v4505_v37 = vpack.c.bf16 %v1112_v25, %v1108_v31  ;;  %v3737_v17 = vld [vmem:[%s5036_s7 + $0x2e0] ss:$28 sps:$4 sm:$0xff]   ;;  %v3743_v21 = vld [vmem:[%s5036_s7 + $0x2a8] ss:$28 sps:$4 sm:$0xff]  }
 0x28f   : > { %v3746_v22 = vld [vmem:[%s5036_s7 + $0x628] ss:$28 sps:$4 sm:$0xff]   ;;  %v3751_v23 = vld [vmem:[%s5036_s7 + $0x274] ss:$28 sps:$4 sm:$0xff]  }
 0x290   : > { %v4493_v32 = vpack.c.bf16 %v1111_v28, %v1107_v26  ;;  %v4495_v33 = vpack.c.bf16 %v1113_v29, %v1109_v27  ;;  %v3754_v24 = vld [vmem:[%s5036_s7 + $0x5f4] ss:$28 sps:$4 sm:$0xff]   ;;  %v3757_v27 = vld [vmem:[%s5036_s7 + $0x23c] ss:$28 sps:$4 sm:$0xff]   ;;  %v3763_v31 = vld [vmem:[%s5036_s7 + $0x204] ss:$28 sps:$4 sm:$0xff]  }
 0x291   : > { %v3749_v25 = vld [vmem:[%s5036_s7 + $0x270] ss:$28 sps:$4 sm:$0xff]   ;;  %v3760_v28 = vld [vmem:[%s5036_s7 + $0x5bc] ss:$28 sps:$4 sm:$0xff]  }
 0x292   : > { %2595 = vmatprep.mubr.bf16.mxu0 %v4493_v32  ;;  %2638 = vmatprep.mubr.bf16.mxu1 %v4495_v33  ;;  %v3752_v26 = vld [vmem:[%s5036_s7 + $0x5f0] ss:$28 sps:$4 sm:$0xff]   ;;  %v3755_v29 = vld [vmem:[%s5036_s7 + $0x238] ss:$28 sps:$4 sm:$0xff]  }
 0x293   : > { %2596 = vmatmul.mubr.bf16.vlgmr.msra.gmra.mxu0 %v4503_v36  ;;  %2639 = vmatmul.mubr.bf16.vlgmr.msra.gmra.mxu1 %v4505_v37  ;;  %v3758_v30 = vld [vmem:[%s5036_s7 + $0x5b8] ss:$28 sps:$4 sm:$0xff]  }
 0x294   : > { %2650 = vmatpush1.bf16.msra.mxu0 %v3677_v34  ;;  %2693 = vmatpush1.bf16.msra.mxu1 %v3680_v35  ;;  %v3766_v34 = vld [vmem:[%s5036_s7 + $0x584] ss:$28 sps:$4 sm:$0xff]  }
 0x295   : > { %2681 = vmatprep.mubr.bf16.mxu0 %v4493_v32  ;;  %2724 = vmatprep.mubr.bf16.mxu1 %v4495_v33  ;;  %v3761_v35 = vld [vmem:[%s5036_s7 + $0x200] ss:$28 sps:$4 sm:$0xff]  }
 0x296   : > { %2651 = vmatprep.subr.bf16.mxu0 %v3685_v38  ;;  %2694 = vmatprep.subr.bf16.mxu1 %v3688_v39  ;;  %v3764_v38 = vld [vmem:[%s5036_s7 + $0x580] ss:$28 sps:$4 sm:$0xff]   ;;  %v3769_v39 = vld [vmem:[%s5036_s7 + $0x1cc] ss:$28 sps:$4 sm:$0xff]  }
 0x298   : > { %2652 = vmatpush1.bf16.msra.mxu0 %v3683_v40  ;;  %2695 = vmatpush1.bf16.msra.mxu1 %v3686_v41  ;;  %v3772_v40 = vld [vmem:[%s5036_s7 + $0x54c] ss:$28 sps:$4 sm:$0xff]  }
 0x299   : > { %2653 = vmatprep.subr.bf16.mxu0 %v3691_v45  ;;  %2696 = vmatprep.subr.bf16.mxu1 %v3694_v46  ;;  %v3767_v41 = vld [vmem:[%s5036_s7 + $0x1c8] ss:$28 sps:$4 sm:$0xff]   ;;  %v3775_v46 = vld [vmem:[%s5036_s7 + $0x19c] ss:$28 sps:$4 sm:$0xff]  }
 0x29a   : > { %v3770_v45 = vld [vmem:[%s5036_s7 + $0x548] ss:$28 sps:$4 sm:$0xff]  }
 0x29c   : > { %2654 = vmatpush1.bf16.msra.mxu0 %v3689_v47  ;;  %2697 = vmatpush1.bf16.msra.mxu1 %v3692_v48  ;;  %v3778_v47 = vld [vmem:[%s5036_s7 + $0x51c] ss:$28 sps:$4 sm:$0xff]  }
 0x29d   : > { %2655 = vmatprep.subr.bf16.mxu0 %v3697_v49  ;;  %2698 = vmatprep.subr.bf16.mxu1 %v3700_v50  ;;  %v3773_v48 = vld [vmem:[%s5036_s7 + $0x198] ss:$28 sps:$4 sm:$0xff]   ;;  %v3781_v50 = vld [vmem:[%s5036_s7 + $0x164] ss:$28 sps:$4 sm:$0xff]  }
 0x29e   : > { %v3776_v49 = vld [vmem:[%s5036_s7 + $0x518] ss:$28 sps:$4 sm:$0xff]  }
 0x2a0   : > { %2656 = vmatpush1.bf16.msra.mxu0 %v3695_v51  ;;  %2699 = vmatpush1.bf16.msra.mxu1 %v3698_v52  ;;  %v3784_v51 = vld [vmem:[%s5036_s7 + $0x4e4] ss:$28 sps:$4 sm:$0xff]  }
 0x2a1   : > { %2657 = vmatprep.subr.bf16.mxu0 %v3703_v53  ;;  %2700 = vmatprep.subr.bf16.mxu1 %v3706_v54  ;;  %v3779_v52 = vld [vmem:[%s5036_s7 + $0x160] ss:$28 sps:$4 sm:$0xff]   ;;  %v3787_v54 = vld [vmem:[%s5036_s7 + $0x12c] ss:$28 sps:$4 sm:$0xff]  }
 0x2a2   : > { %v3782_v53 = vld [vmem:[%s5036_s7 + $0x4e0] ss:$28 sps:$4 sm:$0xff]  }
 0x2a4   : > { %2658 = vmatpush1.bf16.msra.mxu0 %v3701_v55  ;;  %2701 = vmatpush1.bf16.msra.mxu1 %v3704_v56  ;;  %v3790_v55 = vld [vmem:[%s5036_s7 + $0x4ac] ss:$28 sps:$4 sm:$0xff]  }
 0x2a5   : > { %2659 = vmatprep.subr.bf16.mxu0 %v3709_v57  ;;  %2702 = vmatprep.subr.bf16.mxu1 %v3712_v58  ;;  %v3785_v56 = vld [vmem:[%s5036_s7 + $0x128] ss:$28 sps:$4 sm:$0xff]   ;;  %v3793_v58 = vld [vmem:[%s5036_s7 + $0xf4] ss:$28 sps:$4 sm:$0xff]  }
 0x2a6   : > { %v3788_v57 = vld [vmem:[%s5036_s7 + $0x4a8] ss:$28 sps:$4 sm:$0xff]  }
 0x2a8   : > { %2660 = vmatpush1.bf16.msra.mxu0 %v3707_v59  ;;  %2703 = vmatpush1.bf16.msra.mxu1 %v3710_v60  ;;  %v3796_v59 = vld [vmem:[%s5036_s7 + $0x474] ss:$28 sps:$4 sm:$0xff]  }
 0x2a9   : > { %2661 = vmatprep.subr.bf16.mxu0 %v3715_v61  ;;  %2704 = vmatprep.subr.bf16.mxu1 %v3718_v62  ;;  %v3791_v60 = vld [vmem:[%s5036_s7 + $0xf0] ss:$28 sps:$4 sm:$0xff]   ;;  %v3799_v62 = vld [vmem:[%s5036_s7 + $0xbc] ss:$28 sps:$4 sm:$0xff]  }
 0x2aa   : > { %v3794_v61 = vld [vmem:[%s5036_s7 + $0x470] ss:$28 sps:$4 sm:$0xff]  }
 0x2ac   : > { %2662 = vmatpush1.bf16.msra.mxu0 %v3713_v63  ;;  %2705 = vmatpush1.bf16.msra.mxu1 %v3716_v0  ;;  %v3802_v63 = vld [vmem:[%s5036_s7 + $0x43c] ss:$28 sps:$4 sm:$0xff]  }
 0x2ad   : > { %2663 = vmatprep.subr.bf16.mxu0 %v3721_v3  ;;  %2706 = vmatprep.subr.bf16.mxu1 %v3724_v4  ;;  %v3797_v0 = vld [vmem:[%s5036_s7 + $0xb8] ss:$28 sps:$4 sm:$0xff]   ;;  %v3805_v4 = vld [vmem:[%s5036_s7 + $0x84] ss:$28 sps:$4 sm:$0xff]  }
 0x2ae   : > { %v3800_v3 = vld [vmem:[%s5036_s7 + $0x438] ss:$28 sps:$4 sm:$0xff]  }
 0x2b0   : > { %2664 = vmatpush1.bf16.msra.mxu0 %v3719_v5  ;;  %2707 = vmatpush1.bf16.msra.mxu1 %v3722_v6  ;;  %v3808_v5 = vld [vmem:[%s5036_s7 + $0x404] ss:$28 sps:$4 sm:$0xff]  }
 0x2b1   : > { %2665 = vmatprep.subr.bf16.mxu0 %v3727_v7  ;;  %2708 = vmatprep.subr.bf16.mxu1 %v3730_v8  ;;  %v3803_v6 = vld [vmem:[%s5036_s7 + $0x80] ss:$28 sps:$4 sm:$0xff]   ;;  %v3811_v8 = vld [vmem:[%s5036_s7 + $0x4c] ss:$28 sps:$4 sm:$0xff]  }
 0x2b2   : > { %v3806_v7 = vld [vmem:[%s5036_s7 + $0x400] ss:$28 sps:$4 sm:$0xff]  }
 0x2b4   : > { %2666 = vmatpush2.bf16.msra.mxu0 %v3725_v9  ;;  %2709 = vmatpush2.bf16.msra.mxu1 %v3728_v10  ;;  %v3814_v9 = vld [vmem:[%s5036_s7 + $0x3cc] ss:$28 sps:$4 sm:$0xff]  }
 0x2b5   : > { %2667 = vmatprep.subr.bf16.mxu0 %v3733_v11  ;;  %2710 = vmatprep.subr.bf16.mxu1 %v3736_v12  ;;  %v3809_v10 = vld [vmem:[%s5036_s7 + $0x48] ss:$28 sps:$4 sm:$0xff]   ;;  %v3817_v12 = vld [vmem:[%s5036_s7 + $0x14] ss:$28 sps:$4 sm:$0xff]  }
 0x2b6   : > { %v3812_v11 = vld [vmem:[%s5036_s7 + $0x3c8] ss:$28 sps:$4 sm:$0xff]  }
 0x2b8   : > { %2668 = vmatpush2.bf16.msra.mxu0 %v3731_v13  ;;  %2711 = vmatpush2.bf16.msra.mxu1 %v3734_v14  ;;  %v3820_v13 = vld [vmem:[%s5036_s7 + $0x394] ss:$28 sps:$4 sm:$0xff]  }
 0x2b9   : > { %2669 = vmatprep.subr.bf16.mxu0 %v3739_v15  ;;  %2712 = vmatprep.subr.bf16.mxu1 %v3742_v16  ;;  %v3815_v14 = vld [vmem:[%s5036_s7 + $0x10] ss:$28 sps:$4 sm:$0xff]   ;;  %v3823_v16 = vld [vmem:[%s5036_s7 + $0x35c] ss:$28 sps:$4 sm:$0xff]  }
 0x2ba   : > { %v3818_v15 = vld [vmem:[%s5036_s7 + $0x390] ss:$28 sps:$4 sm:$0xff]  }
 0x2bc   : > { %2670 = vmatpush2.bf16.msra.mxu0 %v3737_v17  ;;  %2713 = vmatpush2.bf16.msra.mxu1 %v3740_v18  ;;  %v3826_v17 = vld [vmem:[%s5036_s7 + $0x6dc] ss:$28 sps:$4 sm:$0xff]  }
 0x2bd   : > { %2671 = vmatprep.subr.bf16.mxu0 %v3745_v19  ;;  %2714 = vmatprep.subr.bf16.mxu1 %v3748_v20  ;;  %v3821_v18 = vld [vmem:[%s5036_s7 + $0x358] ss:$28 sps:$4 sm:$0xff]   ;;  %v3829_v20 = vld [vmem:[%s5036_s7 + $0x324] ss:$28 sps:$4 sm:$0xff]  }
 0x2be   : > { %v3824_v19 = vld [vmem:[%s5036_s7 + $0x6d8] ss:$28 sps:$4 sm:$0xff]  }
 0x2c0   : > { %2672 = vmatpush2.bf16.msra.mxu0 %v3743_v21  ;;  %2715 = vmatpush2.bf16.msra.mxu1 %v3746_v22  ;;  %v3832_v21 = vld [vmem:[%s5036_s7 + $0x6a4] ss:$28 sps:$4 sm:$0xff]  }
 0x2c1   : > { %2673 = vmatprep.subr.bf16.mxu0 %v3751_v23  ;;  %2716 = vmatprep.subr.bf16.mxu1 %v3754_v24  ;;  %v3827_v22 = vld [vmem:[%s5036_s7 + $0x320] ss:$28 sps:$4 sm:$0xff]   ;;  %v3835_v24 = vld [vmem:[%s5036_s7 + $0x2ec] ss:$28 sps:$4 sm:$0xff]  }
 0x2c2   : > { %v3830_v23 = vld [vmem:[%s5036_s7 + $0x6a0] ss:$28 sps:$4 sm:$0xff]  }
 0x2c4   : > { %2674 = vmatpush2.bf16.msra.mxu0 %v3749_v25  ;;  %2717 = vmatpush2.bf16.msra.mxu1 %v3752_v26  ;;  %v3838_v25 = vld [vmem:[%s5036_s7 + $0x66c] ss:$28 sps:$4 sm:$0xff]  }
 0x2c5   : > { %2675 = vmatprep.subr.bf16.mxu0 %v3757_v27  ;;  %2718 = vmatprep.subr.bf16.mxu1 %v3760_v28  ;;  %v3833_v26 = vld [vmem:[%s5036_s7 + $0x2e8] ss:$28 sps:$4 sm:$0xff]   ;;  %v3841_v28 = vld [vmem:[%s5036_s7 + $0x2b4] ss:$28 sps:$4 sm:$0xff]  }
 0x2c6   : > { %v3836_v27 = vld [vmem:[%s5036_s7 + $0x668] ss:$28 sps:$4 sm:$0xff]  }
 0x2c8   : > { %2676 = vmatpush2.bf16.msra.mxu0 %v3755_v29  ;;  %2719 = vmatpush2.bf16.msra.mxu1 %v3758_v30  ;;  %v3844_v29 = vld [vmem:[%s5036_s7 + $0x634] ss:$28 sps:$4 sm:$0xff]  }
 0x2c9   : > { %2677 = vmatprep.subr.bf16.mxu0 %v3763_v31  ;;  %2720 = vmatprep.subr.bf16.mxu1 %v3766_v34  ;;  %v3839_v30 = vld [vmem:[%s5036_s7 + $0x2b0] ss:$28 sps:$4 sm:$0xff]   ;;  %v3847_v34 = vld [vmem:[%s5036_s7 + $0x27c] ss:$28 sps:$4 sm:$0xff]  }
 0x2ca   : > { %v3842_v31 = vld [vmem:[%s5036_s7 + $0x630] ss:$28 sps:$4 sm:$0xff]  }
 0x2cc   : > { %2678 = vmatpush2.bf16.msra.mxu0 %v3761_v35  ;;  %2721 = vmatpush2.bf16.msra.mxu1 %v3764_v38  ;;  %v3850_v35 = vld [vmem:[%s5036_s7 + $0x5fc] ss:$28 sps:$4 sm:$0xff]  }
 0x2cd   : > { %2679 = vmatprep.subr.bf16.mxu0 %v3769_v39  ;;  %2722 = vmatprep.subr.bf16.mxu1 %v3772_v40  ;;  %v3845_v38 = vld [vmem:[%s5036_s7 + $0x278] ss:$28 sps:$4 sm:$0xff]   ;;  %v3853_v40 = vld [vmem:[%s5036_s7 + $0x244] ss:$28 sps:$4 sm:$0xff]  }
 0x2ce   : > { %v3848_v39 = vld [vmem:[%s5036_s7 + $0x5f8] ss:$28 sps:$4 sm:$0xff]  }
 0x2d0   : > { %2680 = vmatpush2.bf16.msra.mxu0 %v3767_v41  ;;  %2723 = vmatpush2.bf16.msra.mxu1 %v3770_v45  ;;  %v3856_v41 = vld [vmem:[%s5036_s7 + $0x5c4] ss:$28 sps:$4 sm:$0xff]  }
 0x2d1   : > { %2735 = vmatprep.subr.bf16.mxu0 %v3775_v46  ;;  %2778 = vmatprep.subr.bf16.mxu1 %v3778_v47  ;;  %v3851_v45 = vld [vmem:[%s5036_s7 + $0x240] ss:$28 sps:$4 sm:$0xff]   ;;  %v3859_v47 = vld [vmem:[%s5036_s7 + $0x20c] ss:$28 sps:$4 sm:$0xff]  }
 0x2d2   : > { %v3854_v46 = vld [vmem:[%s5036_s7 + $0x5c0] ss:$28 sps:$4 sm:$0xff]  }
 0x2d3   : > { %2682 = vmatmul.mubr.bf16.vlgmr.msra.gmra.mxu0 %v4503_v36  ;;  %2725 = vmatmul.mubr.bf16.vlgmr.msra.gmra.mxu1 %v4505_v37 }
 0x2d4   : > { %2736 = vmatpush1.bf16.msra.mxu0 %v3773_v48  ;;  %2767 = vmatprep.mubr.bf16.mxu0 %v4493_v32  ;;  %v3862_v48 = vld [vmem:[%s5036_s7 + $0x58c] ss:$28 sps:$4 sm:$0xff]  }
 0x2d5   : > { %2779 = vmatpush1.bf16.msra.mxu1 %v3776_v49  ;;  %2810 = vmatprep.mubr.bf16.mxu1 %v4495_v33  ;;  %v3857_v49 = vld [vmem:[%s5036_s7 + $0x208] ss:$28 sps:$4 sm:$0xff]  }
 0x2d6   : > { %2737 = vmatprep.subr.bf16.mxu0 %v3781_v50  ;;  %2780 = vmatprep.subr.bf16.mxu1 %v3784_v51  ;;  %v3860_v50 = vld [vmem:[%s5036_s7 + $0x588] ss:$28 sps:$4 sm:$0xff]   ;;  %v3865_v51 = vld [vmem:[%s5036_s7 + $0x1d4] ss:$28 sps:$4 sm:$0xff]  }
 0x2d8   : > { %2738 = vmatpush1.bf16.msra.mxu0 %v3779_v52  ;;  %v3868_v52 = vld [vmem:[%s5036_s7 + $0x554] ss:$28 sps:$4 sm:$0xff]  }
 0x2d9   : > { %2781 = vmatpush1.bf16.msra.mxu1 %v3782_v53  ;;  %2739 = vmatprep.subr.bf16.mxu0 %v3787_v54  ;;  %v3863_v53 = vld [vmem:[%s5036_s7 + $0x1d0] ss:$28 sps:$4 sm:$0xff]  }
 0x2da   : > { %2782 = vmatprep.subr.bf16.mxu1 %v3790_v55  ;;  %v3866_v54 = vld [vmem:[%s5036_s7 + $0x550] ss:$28 sps:$4 sm:$0xff]   ;;  %v3869_v55 = vld [vmem:[%s5036_s7 + $0x360] ss:$28 sps:$4 sm:$0xff]  }
 0x2dc   : > { %2740 = vmatpush1.bf16.msra.mxu0 %v3785_v56  ;;  %v3870_v56 = vld [vmem:[%s5036_s7 + $0x6e0] ss:$28 sps:$4 sm:$0xff]  }
 0x2dd   : > { %2783 = vmatpush1.bf16.msra.mxu1 %v3788_v57  ;;  %2741 = vmatprep.subr.bf16.mxu0 %v3793_v58  ;;  %v3871_v57 = vld [vmem:[%s5036_s7 + $0x1a0] ss:$28 sps:$4 sm:$0xff]  }
 0x2de   : > { %2784 = vmatprep.subr.bf16.mxu1 %v3796_v59  ;;  %v3872_v58 = vld [vmem:[%s5036_s7 + $0x520] ss:$28 sps:$4 sm:$0xff]   ;;  %v3873_v59 = vld [vmem:[%s5036_s7 + $0x328] ss:$28 sps:$4 sm:$0xff]  }
 0x2e0   : > { %2742 = vmatpush1.bf16.msra.mxu0 %v3791_v60  ;;  %v3874_v60 = vld [vmem:[%s5036_s7 + $0x6a8] ss:$28 sps:$4 sm:$0xff]  }
 0x2e1   : > { %2785 = vmatpush1.bf16.msra.mxu1 %v3794_v61  ;;  %2743 = vmatprep.subr.bf16.mxu0 %v3799_v62  ;;  %v3875_v61 = vld [vmem:[%s5036_s7 + $0x168] ss:$28 sps:$4 sm:$0xff]  }
 0x2e2   : > { %2786 = vmatprep.subr.bf16.mxu1 %v3802_v63  ;;  %v3876_v62 = vld [vmem:[%s5036_s7 + $0x4e8] ss:$28 sps:$4 sm:$0xff]   ;;  %v3877_v63 = vld [vmem:[%s5036_s7 + $0x2f0] ss:$28 sps:$4 sm:$0xff]  }
 0x2e4   : > { %2744 = vmatpush1.bf16.msra.mxu0 %v3797_v0  ;;  %v3878_v0 = vld [vmem:[%s5036_s7 + $0x670] ss:$28 sps:$4 sm:$0xff]  }
 0x2e5   : > { %2787 = vmatpush1.bf16.msra.mxu1 %v3800_v3  ;;  %2745 = vmatprep.subr.bf16.mxu0 %v3805_v4  ;;  %v3880_v3 = vld [vmem:[%s5036_s7 + $0x4b0] ss:$28 sps:$4 sm:$0xff]   ;;  %v3882_v4 = vld [vmem:[%s5036_s7 + $0x638] ss:$28 sps:$4 sm:$0xff]  }
 0x2e6   : > { %2788 = vmatprep.subr.bf16.mxu1 %v3808_v5  ;;  %v3883_v5 = vld [vmem:[%s5036_s7 + $0xf8] ss:$28 sps:$4 sm:$0xff]  }
 0x2e8   : > { %2746 = vmatpush1.bf16.msra.mxu0 %v3803_v6  ;;  %v3884_v6 = vld [vmem:[%s5036_s7 + $0x478] ss:$28 sps:$4 sm:$0xff]  }
 0x2e9   : > { %2789 = vmatpush1.bf16.msra.mxu1 %v3806_v7  ;;  %2747 = vmatprep.subr.bf16.mxu0 %v3811_v8  ;;  %v3885_v7 = vld [vmem:[%s5036_s7 + $0x280] ss:$28 sps:$4 sm:$0xff]  }
 0x2ea   : > { %2790 = vmatprep.subr.bf16.mxu1 %v3814_v9  ;;  %v3886_v8 = vld [vmem:[%s5036_s7 + $0x600] ss:$28 sps:$4 sm:$0xff]  }
 0x2eb   : > { %v3887_v9 = vld [vmem:[%s5036_s7 + $0xc0] ss:$28 sps:$4 sm:$0xff]  }
 0x2ec   : > { %2748 = vmatpush1.bf16.msra.mxu0 %v3809_v10  ;;  %v3888_v10 = vld [vmem:[%s5036_s7 + $0x440] ss:$28 sps:$4 sm:$0xff]  }
 0x2ed   : > { %2791 = vmatpush1.bf16.msra.mxu1 %v3812_v11  ;;  %2749 = vmatprep.subr.bf16.mxu0 %v3817_v12  ;;  %v3889_v11 = vld [vmem:[%s5036_s7 + $0x248] ss:$28 sps:$4 sm:$0xff]  }
 0x2ee   : > { %2792 = vmatprep.subr.bf16.mxu1 %v3820_v13  ;;  %v3890_v12 = vld [vmem:[%s5036_s7 + $0x5c8] ss:$28 sps:$4 sm:$0xff]  }
 0x2ef   : > { %v3891_v13 = vld [vmem:[%s5036_s7 + $0x88] ss:$28 sps:$4 sm:$0xff]  }
 0x2f0   : > { %2750 = vmatpush1.bf16.msra.mxu0 %v3815_v14  ;;  %v3892_v14 = vld [vmem:[%s5036_s7 + $0x408] ss:$28 sps:$4 sm:$0xff]  }
 0x2f1   : > { %2793 = vmatpush1.bf16.msra.mxu1 %v3818_v15  ;;  %2751 = vmatprep.subr.bf16.mxu0 %v3823_v16  ;;  %v3893_v15 = vld [vmem:[%s5036_s7 + $0x210] ss:$28 sps:$4 sm:$0xff]  }
 0x2f2   : > { %2794 = vmatprep.subr.bf16.mxu1 %v3826_v17  ;;  %v3894_v16 = vld [vmem:[%s5036_s7 + $0x590] ss:$28 sps:$4 sm:$0xff]  }
 0x2f3   : > { %v3895_v17 = vld [vmem:[%s5036_s7 + $0x50] ss:$28 sps:$4 sm:$0xff]  }
 0x2f4   : > { %2752 = vmatpush2.bf16.msra.mxu0 %v3821_v18  ;;  %v3896_v18 = vld [vmem:[%s5036_s7 + $0x3d0] ss:$28 sps:$4 sm:$0xff]  }
 0x2f5   : > { %2795 = vmatpush2.bf16.msra.mxu1 %v3824_v19  ;;  %2753 = vmatprep.subr.bf16.mxu0 %v3829_v20  ;;  %v3897_v19 = vld [vmem:[%s5036_s7 + $0x1d8] ss:$28 sps:$4 sm:$0xff]  }
 0x2f6   : > { %2796 = vmatprep.subr.bf16.mxu1 %v3832_v21  ;;  %v3898_v20 = vld [vmem:[%s5036_s7 + $0x558] ss:$28 sps:$4 sm:$0xff]  }
 0x2f7   : > { %v3899_v21 = vld [vmem:[%s5036_s7 + $0x18] ss:$28 sps:$4 sm:$0xff]  }
 0x2f8   : > { %2754 = vmatpush2.bf16.msra.mxu0 %v3827_v22  ;;  %v3900_v22 = vld [vmem:[%s5036_s7 + $0x398] ss:$28 sps:$4 sm:$0xff]  }
 0x2f9   : > { %2797 = vmatpush2.bf16.msra.mxu1 %v3830_v23  ;;  %2755 = vmatprep.subr.bf16.mxu0 %v3835_v24  ;;  %v4994_v23 = vld [vmem:[%s5037_s8] sm:$0x7f] }
 0x2fa   : > { %2798 = vmatprep.subr.bf16.mxu1 %v3838_v25  ;;  %v1379_v24 = vrot.slane %v4994_v23, %v4283_v44  ;;  %v1383_v25 = vrot.slane %v4994_v23, %v4280_v43 }
 0x2fc   : > { %2756 = vmatpush2.bf16.msra.mxu0 %v3833_v26 }
 0x2fd   : > { %2799 = vmatpush2.bf16.msra.mxu1 %v3836_v27  ;;  %2757 = vmatprep.subr.bf16.mxu0 %v3841_v28 }
 0x2fe   : > { %2800 = vmatprep.subr.bf16.mxu1 %v3844_v29 }
 0x300   : > { %2758 = vmatpush2.bf16.msra.mxu0 %v3839_v30 }
 0x301   : > { %2801 = vmatpush2.bf16.msra.mxu1 %v3842_v31  ;;  %2759 = vmatprep.subr.bf16.mxu0 %v3847_v34 }
 0x302   : > { %2802 = vmatprep.subr.bf16.mxu1 %v3850_v35 }
 0x304   : > { %2760 = vmatpush2.bf16.msra.mxu0 %v3845_v38 }
 0x305   : > { %2803 = vmatpush2.bf16.msra.mxu1 %v3848_v39  ;;  %2761 = vmatprep.subr.bf16.mxu0 %v3853_v40 }
 0x306   : > { %2804 = vmatprep.subr.bf16.mxu1 %v3856_v41 }
 0x308   : > { %2762 = vmatpush2.bf16.msra.mxu0 %v3851_v45 }
 0x309   : > { %2805 = vmatpush2.bf16.msra.mxu1 %v3854_v46  ;;  %2763 = vmatprep.subr.bf16.mxu0 %v3859_v47 }
 0x30a   : > { %2806 = vmatprep.subr.bf16.mxu1 %v3862_v48 }
 0x30c   : > { %2764 = vmatpush2.bf16.msra.mxu0 %v3857_v49 }
 0x30d   : > { %2807 = vmatpush2.bf16.msra.mxu1 %v3860_v50  ;;  %2765 = vmatprep.subr.bf16.mxu0 %v3865_v51  ;;  %v1387_v51 = vrot.slane %v4994_v23, %v690_v2 }
 0x30e   : > { %2808 = vmatprep.subr.bf16.mxu1 %v3868_v52  ;;  %v1391_v52 = vrot.slane %v4994_v23, %v694_v1 }
 0x310   : > { %2766 = vmatpush2.bf16.msra.mxu0 %v3863_v53 }
 0x311   : > { %2809 = vmatpush2.bf16.msra.mxu1 %v3866_v54  ;;  %3377 = vmatprep.subr.bf16.mxu0 %v3869_v55 }
 0x312   : > { %3399 = vmatprep.subr.bf16.mxu1 %v3870_v56 }
 0x313   : > { %2768 = vmatmul.mubr.bf16.vlgmr.msra.gmra.mxu0 %v4503_v36 }
 0x314   : > { %2811 = vmatmul.mubr.bf16.vlgmr.msra.gmra.mxu1 %v4505_v37  ;;  %3378 = vmatpush3.bf16.msra.mxu0 %v3871_v57 }
 0x315   : > { %2853 = vmatprep.mubr.bf16.mxu0 %v4493_v32  ;;  %3400 = vmatpush3.bf16.msra.mxu1 %v3872_v58  ;;  %v3879_v32 = vld [vmem:[%s5036_s7 + $0x130] ss:$28 sps:$4 sm:$0xff]  }
 0x316   : > { %2894 = vmatprep.mubr.bf16.mxu1 %v4495_v33  ;;  %3379 = vmatprep.subr.bf16.mxu0 %v3873_v59  ;;  %v3881_v33 = vld [vmem:[%s5036_s7 + $0x2b8] ss:$28 sps:$4 sm:$0xff]  }
 0x317   : > { %3401 = vmatprep.subr.bf16.mxu1 %v3874_v60 }
 0x318   : > { %3380 = vmatpush3.bf16.msra.mxu0 %v3875_v61 }
 0x319   : > { %3402 = vmatpush3.bf16.msra.mxu1 %v3876_v62  ;;  %3381 = vmatprep.subr.bf16.mxu0 %v3877_v63 }
 0x31a   : > { %3403 = vmatprep.subr.bf16.mxu1 %v3878_v0 }
 0x31c   : > { %3382 = vmatpush3.bf16.msra.mxu0 %v3879_v32 }
 0x31d   : > { %3404 = vmatpush3.bf16.msra.mxu1 %v3880_v3  ;;  %3383 = vmatprep.subr.bf16.mxu0 %v3881_v33 }
 0x31e   : > { %3405 = vmatprep.subr.bf16.mxu1 %v3882_v4 }
 0x320   : > { %3384 = vmatpush3.bf16.msra.mxu0 %v3883_v5 }
 0x321   : > { %3406 = vmatpush3.bf16.msra.mxu1 %v3884_v6  ;;  %3385 = vmatprep.subr.bf16.mxu0 %v3885_v7 }
 0x322   : > { %3407 = vmatprep.subr.bf16.mxu1 %v3886_v8 }
 0x324   : > { %3386 = vmatpush3.bf16.msra.mxu0 %v3887_v9  ;;  %v1394_v9 = vsub.s32 4, %v4277_v42 }
 0x325   : > { %3408 = vmatpush3.bf16.msra.mxu1 %v3888_v10  ;;  %3387 = vmatprep.subr.bf16.mxu0 %v3889_v11  ;;  %v1398_v10 = vsub.s32 5, %v4277_v42 }
 0x326   : > { %3409 = vmatprep.subr.bf16.mxu1 %v3890_v12  ;;  %v1395_v11 = vrot.slane %v4994_v23, %v1394_v9 }
 0x327   : > { %v1399_v12 = vrot.slane %v4994_v23, %v1398_v10 }
 0x328   : > { %3388 = vmatpush3.bf16.msra.mxu0 %v3891_v13 }
 0x329   : > { %3410 = vmatpush3.bf16.msra.mxu1 %v3892_v14  ;;  %3389 = vmatprep.subr.bf16.mxu0 %v3893_v15 }
 0x32a   : > { %3411 = vmatprep.subr.bf16.mxu1 %v3894_v16 }
 0x32c   : > { %3390 = vmatpush3.bf16.msra.mxu0 %v3895_v17 }
 0x32d   : > { %3412 = vmatpush3.bf16.msra.mxu1 %v3896_v18  ;;  %3391 = vmatprep.subr.bf16.mxu0 %v3897_v19 }
 0x32e   : > { %3413 = vmatprep.subr.bf16.mxu1 %v3898_v20 }
 0x330   : > { %3392 = vmatpush3.bf16.msra.mxu0 %v3899_v21 }
 0x331   : > { %3414 = vmatpush3.bf16.msra.mxu1 %v3900_v22 }
 0x333   : > { %2854 = vmatmul.mubr.bf16.vlgmr.msra.gmra.mxu0 %v4503_v36 }
 0x334   : > { %2895 = vmatmul.mubr.bf16.vlgmr.msra.gmra.mxu1 %v4505_v37 }
 0x353   : > { %v2597_v26 = vpop.f32.mrf.mxu0  ;;  %v2640_v27 = vpop.f32.mrf.mxu1 }
 0x354   : > { %v2598_v28 = vadd.f32 %v2597_v26, %v1379_v24 }
 0x355   : > { %v2599_v29 = vpop.f32.mrf.mxu0  ;;  %v2642_v30 = vpop.f32.mrf.mxu1 }
 0x356   : > { %v2641_v36 = vadd.f32 %v2640_v27, %v2598_v28  ;;  %v2600_v31 = vadd.f32 %v2599_v29, %v1383_v25 }
 0x357   : > { %v2601_v37 = vpop.f32.mrf.mxu0  ;;  %v2644_v34 = vpop.f32.mrf.mxu1 }
 0x358   : > { %v2643_v35 = vadd.f32 %v2642_v30, %v2600_v31  ;;  %v2602_v38 = vadd.f32 %v2601_v37, %v1379_v24  ;;  %3901 = vtanh.f32 %v2641_v36 }
 0x359   : > { %v2603_v39 = vpop.f32.mrf.mxu0  ;;  %v2646_v41 = vpop.f32.mrf.mxu1 }
 0x35a   : > { %3903 = vtanh.f32 %v2643_v35  ;;  %v2645_v40 = vadd.f32 %v2644_v34, %v2602_v38  ;;  %v2604_v44 = vadd.f32 %v2603_v39, %v1383_v25  ;;  %v1402_v38 = vsub.s32 6, %v4277_v42 }
 0x35c   : > { %v2647_v45 = vadd.f32 %v2646_v41, %v2604_v44  ;;  %3905 = vtanh.f32 %v2645_v40  ;;  %v1403_v44 = vrot.slane %v4994_v23, %v1402_v38 }
 0x35e   : > { %3907 = vtanh.f32 %v2647_v45 }
 0x365   : > { %v3902_v43 = vpop.eup %3901 }
 0x367   : > { %v3904_v46 = vpop.eup %3903 }
 0x368   : > { %v3360_v47 = vpack.c.bf16 %v3904_v46, %v3902_v43 }
 0x369   : > { %v3906_v48 = vpop.eup %3905 }
 0x36a   : > { %2961 = vst [vmem:[%s5004_s24] sm:$0xff] %v3360_v47 }
 0x36b   : > { %v3908_v49 = vpop.eup %3907 }
 0x36c   : > { %v3364_v50 = vpack.c.bf16 %v3908_v49, %v3906_v48 }
 0x36e   : > { %2966 = vst [vmem:[%s5004_s24 + $0x1c] sm:$0xff] %v3364_v50 }
 0x393   : > { %v2683_v53 = vpop.f32.mrf.mxu0  ;;  %v2726_v54 = vpop.f32.mrf.mxu1 }
 0x394   : > { %v2684_v55 = vadd.f32 %v2683_v53, %v1387_v51 }
 0x395   : > { %v2685_v56 = vpop.f32.mrf.mxu0  ;;  %v2728_v57 = vpop.f32.mrf.mxu1 }
 0x396   : > { %v2727_v58 = vadd.f32 %v2726_v54, %v2684_v55  ;;  %v2686_v59 = vadd.f32 %v2685_v56, %v1391_v52 }
 0x397   : > { %v2687_v60 = vpop.f32.mrf.mxu0  ;;  %v2730_v61 = vpop.f32.mrf.mxu1 }
 0x398   : > { %v2729_v62 = vadd.f32 %v2728_v57, %v2686_v59  ;;  %v2688_v63 = vadd.f32 %v2687_v60, %v1387_v51  ;;  %3909 = vtanh.f32 %v2727_v58 }
 0x399   : > { %v2689_v0 = vpop.f32.mrf.mxu0  ;;  %v2732_v3 = vpop.f32.mrf.mxu1 }
 0x39a   : > { %3911 = vtanh.f32 %v2729_v62  ;;  %v2731_v2 = vadd.f32 %v2730_v61, %v2688_v63  ;;  %v2690_v32 = vadd.f32 %v2689_v0, %v1391_v52 }
 0x39c   : > { %v2733_v1 = vadd.f32 %v2732_v3, %v2690_v32  ;;  %3913 = vtanh.f32 %v2731_v2 }
 0x39e   : > { %3915 = vtanh.f32 %v2733_v1 }
 0x3a5   : > { %v3910_v33 = vpop.eup %3909 }
 0x3a7   : > { %v3912_v4 = vpop.eup %3911 }
 0x3a8   : > { %v3361_v5 = vpack.c.bf16 %v3912_v4, %v3910_v33 }
 0x3a9   : > { %v3914_v6 = vpop.eup %3913 }
 0x3aa   : > { %2962 = vst [vmem:[%s5004_s24 + $0x8] sm:$0xff] %v3361_v5 }
 0x3ab   : > { %v3916_v7 = vpop.eup %3915 }
 0x3ac   : > { %v3365_v8 = vpack.c.bf16 %v3916_v7, %v3914_v6 }
 0x3ae   : > { %2967 = vst [vmem:[%s5004_s24 + $0x24] sm:$0xff] %v3365_v8 }
 0x3d3   : > { %v2769_v13 = vpop.f32.mrf.mxu0 }
 0x3d4   : > { %v2770_v14 = vadd.f32 %v2769_v13, %v1395_v11  ;;  %v2812_v15 = vpop.f32.mrf.mxu1 }
 0x3d5   : > { %v2771_v16 = vpop.f32.mrf.mxu0 }
 0x3d6   : > { %v2813_v17 = vadd.f32 %v2812_v15, %v2770_v14  ;;  %v2772_v18 = vadd.f32 %v2771_v16, %v1399_v12  ;;  %v2814_v19 = vpop.f32.mrf.mxu1 }
 0x3d7   : > { %v2773_v20 = vpop.f32.mrf.mxu0 }
 0x3d8   : > { %v2815_v21 = vadd.f32 %v2814_v19, %v2772_v18  ;;  %v2774_v22 = vadd.f32 %v2773_v20, %v1395_v11  ;;  %v2816_v24 = vpop.f32.mrf.mxu1  ;;  %3917 = vtanh.f32 %v2813_v17 }
 0x3d9   : > { %v2775_v25 = vpop.f32.mrf.mxu0 }
 0x3da   : > { %3919 = vtanh.f32 %v2815_v21  ;;  %v2817_v26 = vadd.f32 %v2816_v24, %v2774_v22  ;;  %v2776_v27 = vadd.f32 %v2775_v25, %v1399_v12  ;;  %v2818_v28 = vpop.f32.mrf.mxu1 }
 0x3dc   : > { %v2819_v29 = vadd.f32 %v2818_v28, %v2776_v27  ;;  %3921 = vtanh.f32 %v2817_v26 }
 0x3de   : > { %3923 = vtanh.f32 %v2819_v29 }
 0x3e5   : > { %v3918_v30 = vpop.eup %3917 }
 0x3e7   : > { %v3920_v36 = vpop.eup %3919 }
 0x3e8   : > { %v3362_v31 = vpack.c.bf16 %v3920_v36, %v3918_v30 }
 0x3e9   : > { %v3922_v37 = vpop.eup %3921 }
 0x3ea   : > { %2963 = vst [vmem:[%s5004_s24 + $0x10] sm:$0xff] %v3362_v31 }
 0x3eb   : > { %v3924_v34 = vpop.eup %3923 }
 0x3ec   : > { %v3366_v35 = vpack.c.bf16 %v3924_v34, %v3922_v37 }
 0x3ee   : > { %2968 = vst [vmem:[%s5004_s24 + $0x2c] sm:$0xff] %v3366_v35 }
 0x3f3   : > { %v3393_v39 = vpop.f32.mrf.mxu0 }
 0x3f4   : > { %v3415_v40 = vpop.f32.mrf.mxu1 }
 0x3f5   : > { %v3394_v41 = vpop.f32.mrf.mxu0 }
 0x3f6   : > { %v3395_v45 = vadd.f32 %v3394_v41, %v3393_v39  ;;  %v3416_v43 = vpop.f32.mrf.mxu1 }
 0x3f7   : > { %v3396_v46 = vpop.f32.mrf.mxu0  ;;  %v3417_v48 = vadd.f32 %v3416_v43, %v3415_v40 }
 0x3f8   : > { %v2856_v47 = vadd.f32 %v3395_v45, %v1403_v44  ;;  %v3418_v49 = vpop.f32.mrf.mxu1 }
 0x3f9   : > { %v3397_v50 = vpop.f32.mrf.mxu0 }
 0x3fa   : > { %v2897_v51 = vadd.f32 %v3417_v48, %v2856_v47  ;;  %v3398_v52 = vadd.f32 %v3397_v50, %v3396_v46  ;;  %v3419_v53 = vpop.f32.mrf.mxu1 }
 0x3fb   : > { %v3420_v42 = vadd.f32 %v3419_v53, %v3418_v49 }
 0x3fc   : > { %3925 = vtanh.f32 %v2897_v51  ;;  %v2859_v54 = vadd.f32 %v3398_v52, %v1403_v44 }
 0x3fe   : > { %v2900_v55 = vadd.f32 %v3420_v42, %v2859_v54 }
 0x400   : > { %3927 = vtanh.f32 %v2900_v55 }
 0x409   : > { %v3926_v56 = vpop.eup %3925 }
 0x40a   : > { %v3363_v23 = vpack.c.bf16 %v3926_v56, %v3926_v56 }
 0x40c   : > { %2965 = vst.msk [vmem:[%s5004_s24 + $0x18] sm:$0xf] %vm2964_vm1, %v3363_v23 }
 0x40d   : > { %v3928_v57 = vpop.eup %3927 }
 0x40e   : > { %v3367_v58 = vpack.c.bf16 %v3928_v57, %v3928_v57 }
 0x410   : > { %2969 = vst.msk [vmem:[%s5004_s24 + $0x34] sm:$0xf] %vm2964_vm1, %v3367_v58 }
 0x411 PF: > { %s19_s30 = sadd.s32 1, %s3935_s30  }
 0x412   : > { %p16_p4 = scmp.ge.s32.totalorder %s19_s30, 4  }
 0x414   :  { %18 = sbr.rel (!%p16_p4) target bundleno = 1 (0x1), region = 86 }

</bundles_post_ra>
